<compile_context>
chip_gen: v5e
topology: v5e:2x2
jax: 0.10.0
libtpu: 0.0.40
codegen_flags: <defaults>
</compile_context>

<pallas_src>
import jax
import jax.numpy as jnp
from jax.experimental import pallas as pl
from jax.experimental.pallas import tpu as pltpu

EPS = 1e-5


def conv_bn_add_kernel(x_ref, w_ref, gamma_ref, beta_ref, res_ref, o_ref):
    # x_ref               : (Cin,  M)   f32
    # w_ref               : (Cout, Cin) f32
    # gamma_ref, beta_ref : (Cout, 1)   f32
    # res_ref, o_ref      : (Cout, M)   f32
    x = x_ref[...].astype(jnp.bfloat16)
    w = w_ref[...].astype(jnp.bfloat16)

    # 1x1 conv == channel matmul on the MXU (bf16 in, f32 accumulate)
    y = jnp.dot(w, x, preferred_element_type=jnp.float32)            # (Cout, M)

    # BatchNorm (training-mode biased batch stats over N*H*W), two-step stats
    # on the resident tile to avoid E[y^2]-E[y]^2 cancellation.
    inv_m = 1.0 / y.shape[1]
    mean = jnp.sum(y, axis=1, keepdims=True) * inv_m                  # (Cout, 1)
    centered = y - mean
    var = jnp.sum(centered * centered, axis=1, keepdims=True) * inv_m # biased var
    scale = gamma_ref[...] * jax.lax.rsqrt(var + EPS)                 # (Cout, 1)

    # residual add fused with BN affine
    o_ref[...] = res_ref[...] + centered * scale + beta_ref[...]


@jax.jit
def conv_bn_add(x101, x89, weight, gamma, beta):
    """x101, x89: (N, C, H, W) f32; weight: (Cout, Cin, 1, 1); gamma/beta: (Cout,)."""
    N, C, H, W = x101.shape
    Cout = weight.shape[0]
    M = N * H * W

    # channels-on-sublanes views: (C, N*H*W).  For N == 1 these are pure reshapes.
    x_cm = jnp.moveaxis(x101.reshape(N, C, H * W), 0, 1).reshape(C, M)
    r_cm = jnp.moveaxis(x89.reshape(N, Cout, H * W), 0, 1).reshape(Cout, M)
    w_mat = weight.reshape(Cout, C)                                    # (Cout, Cin)
    g = gamma.reshape(Cout, 1)
    b = beta.reshape(Cout, 1)

    # Advisory cost estimate for XLA scheduling around this tiny custom call.
    bytes_accessed = 4 * (C * M + Cout * C + 2 * Cout + 2 * Cout * M)
    cost = pl.CostEstimate(
        flops=2 * Cout * C * M + 6 * Cout * M,
        transcendentals=Cout,
        bytes_accessed=bytes_accessed,
    )

    # Single grid step: the whole problem fits in VMEM on every generation,
    # so a multi-step grid only added per-step overhead + duplicate casts.
    out_cm = pl.pallas_call(
        conv_bn_add_kernel,
        out_shape=jax.ShapeDtypeStruct((Cout, M), jnp.float32),
        grid=(1,),
        in_specs=[
            pl.BlockSpec((C, M), lambda i: (0, 0)),        # x slab
            pl.BlockSpec((Cout, C), lambda i: (0, 0)),     # conv weight
            pl.BlockSpec((Cout, 1), lambda i: (0, 0)),     # gamma
            pl.BlockSpec((Cout, 1), lambda i: (0, 0)),     # beta
            pl.BlockSpec((Cout, M), lambda i: (0, 0)),     # residual
        ],
        out_specs=pl.BlockSpec((Cout, M), lambda i: (0, 0)),
        compiler_params=pltpu.CompilerParams(
            dimension_semantics=("arbitrary",)),
        cost_estimate=cost,
    )(x_cm, w_mat, g, b, r_cm)

    # (Cout, N*H*W) -> NCHW (pure reshape for N == 1)
    return jnp.moveaxis(out_cm.reshape(Cout, N, H, W), 1, 0)


def reference(x101, x89, weight, gamma, beta):
    Cout, Cin = weight.shape[0], weight.shape[1]
    w2 = weight.reshape(Cout, Cin)
    y = jnp.einsum('nchw,oc->nohw', x101, w2)
    mean = jnp.mean(y, axis=(0, 2, 3), keepdims=True)
    var = jnp.var(y, axis=(0, 2, 3), keepdims=True)                   # biased
    bn = (y - mean) / jnp.sqrt(var + EPS)
    bn = bn * gamma.reshape(1, -1, 1, 1) + beta.reshape(1, -1, 1, 1)
    return x89 + bn


if __name__ == "__main__":
    N, C, H, W = 1, 208, 14, 14

    key = jax.random.PRNGKey(0)
    k1, k2, k3, k4, k5 = jax.random.split(key, 5)

    x101 = jax.random.normal(k1, (N, C, H, W), dtype=jnp.float32)
    x89 = jax.random.normal(k2, (N, C, H, W), dtype=jnp.float32)

    # Conv2d(208, 208, 1, bias=False) weight + BatchNorm2d affine parameters
    weight = jax.random.normal(k3, (C, C, 1, 1), dtype=jnp.float32) * 0.05
    gamma = 1.0 + 0.1 * jax.random.normal(k4, (C,), dtype=jnp.float32)
    beta = 0.1 * jax.random.normal(k5, (C,), dtype=jnp.float32)

    out = jax.block_until_ready(conv_bn_add(x101, x89, weight, gamma, beta))
    ref = jax.block_until_ready(reference(x101, x89, weight, gamma, beta))

    assert out.shape == (N, C, H, W)
    max_err = float(jnp.max(jnp.abs(out - ref)))
    # bf16 matmul inputs (f32 accumulation) -> ~1e-3 level error vs f32 reference
    assert jnp.allclose(out, ref, rtol=2e-2, atol=2e-2), \
        f"mismatch vs reference (max abs err {max_err})"

    print("KERNEL_OK")
</pallas_src>

<mosaic_0001>
module attributes {stable_mosaic.version = 11 : i64} {
  func.func @conv_bn_add_kernel(%arg0: i32, %arg1: memref<208x196xf32, #tpu.memory_space<vmem>>, %arg2: memref<208x208xf32, #tpu.memory_space<vmem>>, %arg3: memref<208x1xf32, #tpu.memory_space<vmem>>, %arg4: memref<208x1xf32, #tpu.memory_space<vmem>>, %arg5: memref<208x196xf32, #tpu.memory_space<vmem>>, %arg6: memref<208x196xf32, #tpu.memory_space<vmem>>) attributes {dimension_semantics = [#tpu.dimension_semantics<arbitrary>], iteration_bounds = array<i64: 1>, scalar_prefetch = 0 : i64, scratch_operands = 0 : i64, tpu.core_type = #tpu.core_type<tc>, window_params = [{pipeline_mode = #tpu.pipeline_mode<synchronous>, transform_indices = @transform_0, window_bounds = array<i64: 208, 196>}, {pipeline_mode = #tpu.pipeline_mode<synchronous>, transform_indices = @transform_1, window_bounds = array<i64: 208, 208>}, {pipeline_mode = #tpu.pipeline_mode<synchronous>, transform_indices = @transform_2, window_bounds = array<i64: 208, 1>}, {pipeline_mode = #tpu.pipeline_mode<synchronous>, transform_indices = @transform_3, window_bounds = array<i64: 208, 1>}, {pipeline_mode = #tpu.pipeline_mode<synchronous>, transform_indices = @transform_4, window_bounds = array<i64: 208, 196>}, {pipeline_mode = #tpu.pipeline_mode<synchronous>, transform_indices = @transform_5, window_bounds = array<i64: 208, 196>}]} {
    %c0 = arith.constant 0 : index
    %c0_0 = arith.constant 0 : index
    %0 = vector.load %arg1[%c0, %c0_0] : memref<208x196xf32, #tpu.memory_space<vmem>>, vector<208x196xf32>
    %1 = arith.truncf %0 : vector<208x196xf32> to vector<208x196xbf16>
    %c0_1 = arith.constant 0 : index
    %c0_2 = arith.constant 0 : index
    %2 = vector.load %arg2[%c0_1, %c0_2] : memref<208x208xf32, #tpu.memory_space<vmem>>, vector<208x208xf32>
    %3 = arith.truncf %2 : vector<208x208xf32> to vector<208x208xbf16>
    %cst = arith.constant dense<0.000000e+00> : vector<208x196xf32>
    %4 = tpu.matmul %3, %1, %cst {dimension_numbers = #tpu.dot_dimension_numbers<[1], [0], [0], [1], [0, 0, 1, 1], [], []>} : vector<208x208xbf16>, vector<208x196xbf16>, vector<208x196xf32> -> vector<208x196xf32>
    %cst_3 = arith.constant dense<0.000000e+00> : vector<208xf32>
    %5 = vector.multi_reduction <add>, %4, %cst_3 [1] : vector<208x196xf32> to vector<208xf32>
    %6 = vector.shape_cast %5 : vector<208xf32> to vector<208x1xf32>
    %cst_4 = arith.constant 0.00510204071 : f32
    %7 = vector.broadcast %cst_4 : f32 to vector<208x1xf32>
    %8 = arith.mulf %6, %7 : vector<208x1xf32>
    %9 = vector.broadcast %8 : vector<208x1xf32> to vector<208x196xf32>
    %10 = arith.subf %4, %9 : vector<208x196xf32>
    %11 = arith.mulf %10, %10 : vector<208x196xf32>
    %cst_5 = arith.constant dense<0.000000e+00> : vector<208xf32>
    %12 = vector.multi_reduction <add>, %11, %cst_5 [1] : vector<208x196xf32> to vector<208xf32>
    %13 = vector.shape_cast %12 : vector<208xf32> to vector<208x1xf32>
    %cst_6 = arith.constant 0.00510204071 : f32
    %14 = vector.broadcast %cst_6 : f32 to vector<208x1xf32>
    %15 = arith.mulf %13, %14 : vector<208x1xf32>
    %c0_7 = arith.constant 0 : index
    %c0_8 = arith.constant 0 : index
    %16 = vector.load %arg3[%c0_7, %c0_8] : memref<208x1xf32, #tpu.memory_space<vmem>>, vector<208x1xf32>
    %cst_9 = arith.constant 9.99999974E-6 : f32
    %17 = vector.broadcast %cst_9 : f32 to vector<208x1xf32>
    %18 = arith.addf %15, %17 : vector<208x1xf32>
    %19 = math.rsqrt %18 : vector<208x1xf32>
    %20 = arith.mulf %16, %19 : vector<208x1xf32>
    %c0_10 = arith.constant 0 : index
    %c0_11 = arith.constant 0 : index
    %21 = vector.load %arg5[%c0_10, %c0_11] : memref<208x196xf32, #tpu.memory_space<vmem>>, vector<208x196xf32>
    %22 = vector.broadcast %20 : vector<208x1xf32> to vector<208x196xf32>
    %23 = arith.mulf %10, %22 : vector<208x196xf32>
    %24 = arith.addf %21, %23 : vector<208x196xf32>
    %c0_12 = arith.constant 0 : index
    %c0_13 = arith.constant 0 : index
    %25 = vector.load %arg4[%c0_12, %c0_13] : memref<208x1xf32, #tpu.memory_space<vmem>>, vector<208x1xf32>
    %26 = vector.broadcast %25 : vector<208x1xf32> to vector<208x196xf32>
    %27 = arith.addf %24, %26 : vector<208x196xf32>
    %c0_14 = arith.constant 0 : index
    %c0_15 = arith.constant 0 : index
    %28 = vector.load %arg6[%c0_14, %c0_15] : memref<208x196xf32, #tpu.memory_space<vmem>>, vector<208x196xf32>
    tpu.vector_store %arg6[%c0_14, %c0_15], %27 {strides = array<i32>} : memref<208x196xf32, #tpu.memory_space<vmem>>, vector<208x196xf32>,
    return
  }
  func.func @transform_0(%arg0: i32) -> (i32, i32) {
    %c0_i32 = arith.constant 0 : i32
    %c0_i32_0 = arith.constant 0 : i32
    %c0_i32_1 = arith.constant 0 : i32
    return %c0_i32, %c0_i32_0 : i32, i32
  }
  func.func @transform_1(%arg0: i32) -> (i32, i32) {
    %c0_i32 = arith.constant 0 : i32
    %c0_i32_0 = arith.constant 0 : i32
    %c0_i32_1 = arith.constant 0 : i32
    return %c0_i32, %c0_i32_0 : i32, i32
  }
  func.func @transform_2(%arg0: i32) -> (i32, i32) {
    %c0_i32 = arith.constant 0 : i32
    %c0_i32_0 = arith.constant 0 : i32
    %c0_i32_1 = arith.constant 0 : i32
    return %c0_i32, %c0_i32_0 : i32, i32
  }
  func.func @transform_3(%arg0: i32) -> (i32, i32) {
    %c0_i32 = arith.constant 0 : i32
    %c0_i32_0 = arith.constant 0 : i32
    %c0_i32_1 = arith.constant 0 : i32
    return %c0_i32, %c0_i32_0 : i32, i32
  }
  func.func @transform_4(%arg0: i32) -> (i32, i32) {
    %c0_i32 = arith.constant 0 : i32
    %c0_i32_0 = arith.constant 0 : i32
    %c0_i32_1 = arith.constant 0 : i32
    return %c0_i32, %c0_i32_0 : i32, i32
  }
  func.func @transform_5(%arg0: i32) -> (i32, i32) {
    %c0_i32 = arith.constant 0 : i32
    %c0_i32_0 = arith.constant 0 : i32
    %c0_i32_1 = arith.constant 0 : i32
    return %c0_i32, %c0_i32_0 : i32, i32
  }
}

</mosaic_0001>

<bundles_post_ra>
// kernel: conv_bn_add.1
= control target key start
LH: loop header
LB: loop body
LE: loop exit
PB: predicated region body
PF: predicated region fallthrough
CT: control target
= control target key end

     0   :  { %v1848_v3 = vmov 0   ;;  %vm177_vm0 = vcmask 654336   ;;  %vm513_vm1 = vcmask 556032   ;;  %s3513_s0 = inlined_call_operand.vmem [shape: f32[208,196], index: 0, kind: input, shape index: {}]   ;;  %s3514_s3 = inlined_call_operand.vmem [shape: f32[208,1], index: 3, kind: input, shape index: {}]   ;;  %s3515_s1 = inlined_call_operand.vmem [shape: f32[208,208], index: 1, kind: input, shape index: {}]   ;;  %s3516_s2 = inlined_call_operand.vmem [shape: f32[208,1], index: 2, kind: input, shape index: {}]   ;;  %s3517_s4 = inlined_call_operand.vmem [shape: f32[208,196], index: 4, kind: input, shape index: {}]   ;;  %s3518_s5 = inlined_call_operand.vmem [shape: f32[208,196], index: 5, kind: output, shape index: {}]  }
   0x1   :  { %v49_v0 = vld [vmem:[%s3513_s0 + $0xe0] sm:$0xff]  ;;  %v51_v1 = vld [vmem:[%s3513_s0 + $0xf0] sm:$0xff]  ;;  %v50_v2 = vld [vmem:[%s3513_s0 + $0xe8] sm:$0xff]  ;;  %1794 = vset.pattern.permute.xlu0 %v1848_v3  ;;  %1793 = vset.pattern.permute.xlu1 %v1848_v3 }
   0x2   :  { %v87_v4 = vpack.c.bf16 %v51_v1, %v49_v0  ;;  %v52_v5 = vld [vmem:[%s3513_s0 + $0xf8] sm:$0xff]  ;;  %v45_v6 = vld [vmem:[%s3513_s0 + $0xc0] sm:$0xff]  ;;  %v47_v7 = vld [vmem:[%s3513_s0 + $0xd0] sm:$0xff]  ;;  %1795 = vset.pattern.permute.xlu2 %v1848_v3 }
   0x3   :  { %v88_v8 = vpack.c.bf16 %v52_v5, %v50_v2  ;;  %v46_v9 = vld [vmem:[%s3513_s0 + $0xc8] sm:$0xff]  ;;  %v48_v10 = vld [vmem:[%s3513_s0 + $0xd8] sm:$0xff]  ;;  %v85_v12 = vpack.c.bf16 %v47_v7, %v45_v6  ;;  %v41_v14 = vld [vmem:[%s3513_s0 + $0xa0] sm:$0xff] }
   0x4   :  { %v70_v11 = vld [vmem:[%s3513_s0 + $0x188] sm:$0xff]  ;;  %217 = vmatpush.bf16.msra.mxu0 %v87_v4  ;;  %v72_v13 = vld [vmem:[%s3513_s0 + $0x198] sm:$0xff]  ;;  %v43_v15 = vld [vmem:[%s3513_s0 + $0xb0] sm:$0xff]  ;;  %v86_v16 = vpack.c.bf16 %v48_v10, %v46_v9 }
   0x5   :  { %365 = vmatpush.bf16.msra.mxu2 %v88_v8  ;;  %v98_v17 = vpack.c.bf16 %v72_v13, %v70_v11  ;;  %v42_v18 = vld [vmem:[%s3513_s0 + $0xa8] sm:$0xff]  ;;  %v44_v19 = vld [vmem:[%s3513_s0 + $0xb8] sm:$0xff]  ;;  %v69_v22 = vld [vmem:[%s3513_s0 + $0x180] sm:$0xff]  ;;  %v83_v26 = vpack.c.bf16 %v43_v15, %v41_v14 }
   0x6   :  { %v66_v20 = vld [vmem:[%s3513_s0 + $0x168] sm:$0xff]  ;;  %v68_v21 = vld [vmem:[%s3513_s0 + $0x178] sm:$0xff]  ;;  %v71_v23 = vld [vmem:[%s3513_s0 + $0x190] sm:$0xff]  ;;  %v84_v30 = vpack.c.bf16 %v44_v19, %v42_v18 }
   0x7   :  { %442 = vmatpush.bf16.msra.mxu3 %v98_v17  ;;  %v96_v24 = vpack.c.bf16 %v68_v21, %v66_v20  ;;  %v97_v25 = vpack.c.bf16 %v71_v23, %v69_v22  ;;  %v37_v27 = vld [vmem:[%s3513_s0 + $0x80] sm:$0xff]  ;;  %v62_v28 = vld [vmem:[%s3513_s0 + $0x148] sm:$0xff]  ;;  %v64_v29 = vld [vmem:[%s3513_s0 + $0x158] sm:$0xff] }
   0x8   :  { %218 = vmatpush.bf16.msra.mxu0 %v85_v12  ;;  %v39_v31 = vld [vmem:[%s3513_s0 + $0x90] sm:$0xff]  ;;  %v65_v32 = vld [vmem:[%s3513_s0 + $0x160] sm:$0xff]  ;;  %v38_v34 = vld [vmem:[%s3513_s0 + $0x88] sm:$0xff]  ;;  %v94_v37 = vpack.c.bf16 %v64_v29, %v62_v28 }
   0x9   :  { %366 = vmatpush.bf16.msra.mxu2 %v86_v16  ;;  %294 = vmatpush.bf16.msra.mxu1 %v97_v25  ;;  %v67_v33 = vld [vmem:[%s3513_s0 + $0x170] sm:$0xff]  ;;  %v40_v35 = vld [vmem:[%s3513_s0 + $0x98] sm:$0xff]  ;;  %v58_v38 = vld [vmem:[%s3513_s0 + $0x128] sm:$0xff]  ;;  %v81_v40 = vpack.c.bf16 %v39_v31, %v37_v27 }
   0xa   :  { %v95_v36 = vpack.c.bf16 %v67_v33, %v65_v32  ;;  %v1503_v39 = vld [vmem:[%s3514_s3 + $0x8] sm:$0xff]  ;;  %v60_v41 = vld [vmem:[%s3513_s0 + $0x138] sm:$0xff]  ;;  %v61_v42 = vld [vmem:[%s3513_s0 + $0x140] sm:$0xff]  ;;  %v82_v44 = vpack.c.bf16 %v40_v35, %v38_v34 }
   0xb   :  { %443 = vmatpush.bf16.msra.mxu3 %v96_v24  ;;  %1535 = vperm.xlu0 %1794, %v1503_v39   ;;  %v63_v43 = vld [vmem:[%s3513_s0 + $0x150] sm:$0xff]  ;;  %v33_v45 = vld [vmem:[%s3513_s0 + $0x60] sm:$0xff]  ;;  %v34_v48 = vld [vmem:[%s3513_s0 + $0x68] sm:$0xff]  ;;  %v92_v51 = vpack.c.bf16 %v60_v41, %v58_v38 }
   0xc   :  { %219 = vmatpush.bf16.msra.mxu0 %v83_v26  ;;  %v35_v46 = vld [vmem:[%s3513_s0 + $0x70] sm:$0xff]  ;;  %v93_v47 = vpack.c.bf16 %v63_v43, %v61_v42  ;;  %v36_v49 = vld [vmem:[%s3513_s0 + $0x78] sm:$0xff]  ;;  %v57_v50 = vld [vmem:[%s3513_s0 + $0x120] sm:$0xff] }
   0xd   :  { %367 = vmatpush.bf16.msra.mxu2 %v84_v30  ;;  %295 = vmatpush.bf16.msra.mxu1 %v95_v36  ;;  %v59_v52 = vld [vmem:[%s3513_s0 + $0x130] sm:$0xff]  ;;  %v79_v53 = vpack.c.bf16 %v35_v46, %v33_v45  ;;  %v29_v54 = vld [vmem:[%s3513_s0 + $0x40] sm:$0xff]  ;;  %v54_v55 = vld [vmem:[%s3513_s0 + $0x108] sm:$0xff]  ;;  %v80_v57 = vpack.c.bf16 %v36_v49, %v34_v48 }
   0xe   :  { %v56_v56 = vld [vmem:[%s3513_s0 + $0x118] sm:$0xff]  ;;  %v31_v58 = vld [vmem:[%s3513_s0 + $0x50] sm:$0xff]  ;;  %v30_v59 = vld [vmem:[%s3513_s0 + $0x48] sm:$0xff]  ;;  %v91_v60 = vpack.c.bf16 %v59_v52, %v57_v50 }
   0xf   :  { %444 = vmatpush.bf16.msra.mxu3 %v94_v37  ;;  %v1506_v61 = vld [vmem:[%s3514_s3 + $0x20] sm:$0xff]  ;;  %v32_v62 = vld [vmem:[%s3513_s0 + $0x58] sm:$0xff]  ;;  %v55_v0 = vld [vmem:[%s3513_s0 + $0x110] sm:$0xff]  ;;  %v90_v1 = vpack.c.bf16 %v56_v56, %v54_v55  ;;  %v77_v4 = vpack.c.bf16 %v31_v58, %v29_v54 }
  0x10   :  { %220 = vmatpush.bf16.msra.mxu0 %v81_v40  ;;  %v53_v63 = vld [vmem:[%s3513_s0 + $0x100] sm:$0xff]  ;;  %v100_v2 = vld [vmem:[%s3515_s1 + $0x8] sm:$0xff]  ;;  %v102_v3 = vld [vmem:[%s3515_s1 + $0x18] sm:$0xff]  ;;  %v78_v5 = vpack.c.bf16 %v32_v62, %v30_v59 }
  0x11   :  { %368 = vmatpush.bf16.msra.mxu2 %v82_v44  ;;  %296 = vmatpush.bf16.msra.mxu1 %v93_v47  ;;  %v25_v6 = vld [vmem:[%s3513_s0 + $0x20] sm:$0xff]  ;;  %v27_v7 = vld [vmem:[%s3513_s0 + $0x30] sm:$0xff]  ;;  %v89_v8 = vpack.c.bf16 %v55_v0, %v53_v63  ;;  %v152_v10 = vpack.c.bf16 %v102_v3, %v100_v2  ;;  %v26_v11 = vld [vmem:[%s3513_s0 + $0x28] sm:$0xff] }
  0x12   :  { %v1502_v9 = vld [vmem:[%s3514_s3] sm:$0xff]  ;;  %v28_v12 = vld [vmem:[%s3513_s0 + $0x38] sm:$0xff]  ;;  %v75_v13 = vpack.c.bf16 %v27_v7, %v25_v6  ;;  %v23_v16 = vld [vmem:[%s3513_s0 + $0x10] sm:$0xff] }
  0x13   :  { %445 = vmatpush.bf16.msra.mxu3 %v92_v51  ;;  %1550 = vperm.xlu0 %1794, %v1506_v61   ;;  %v76_v14 = vpack.c.bf16 %v28_v12, %v26_v11  ;;  %v21_v15 = vld [vmem:[%s3513_s0] sm:$0xff]  ;;  %v22_v17 = vld [vmem:[%s3513_s0 + $0x8] sm:$0xff]  ;;  %v24_v18 = vld [vmem:[%s3513_s0 + $0x18] sm:$0xff] }
  0x14   :  { %221 = vmatpush.bf16.msra.mxu0 %v79_v53  ;;  %1530 = vperm.xlu1 %1793, %v1502_v9   ;;  %v1509_v19 = vld [vmem:[%s3514_s3 + $0x38] sm:$0xff]  ;;  %v73_v21 = vpack.c.bf16 %v23_v16, %v21_v15  ;;  %v99_v22 = vld [vmem:[%s3515_s1] sm:$0xff]  ;;  %v101_v23 = vld [vmem:[%s3515_s1 + $0x10] sm:$0xff]  ;;  %v74_v24 = vpack.c.bf16 %v24_v18, %v22_v17 }
  0x15   :  { %369 = vmatpush.bf16.msra.mxu2 %v80_v57  ;;  %297 = vmatpush.bf16.msra.mxu1 %v91_v60  ;;  %v1505_v20 = vld [vmem:[%s3514_s3 + $0x18] sm:$0xff]  ;;  %v151_v25 = vpack.c.bf16 %v101_v23, %v99_v22  ;;  %v1512_v26 = vld [vmem:[%s3514_s3 + $0x50] sm:$0xff]  ;;  %v104_v27 = vld [vmem:[%s3515_s1 + $0x28] sm:$0xff] }
  0x16   :  { %v106_v28 = vld [vmem:[%s3515_s1 + $0x38] sm:$0xff]  ;;  %v1508_v29 = vld [vmem:[%s3514_s3 + $0x30] sm:$0xff]  ;;  %v1515_v31 = vld [vmem:[%s3514_s3 + $0x68] sm:$0xff] }
  0x17   :  { %446 = vmatpush.bf16.msra.mxu3 %v90_v1  ;;  %v154_v30 = vpack.c.bf16 %v106_v28, %v104_v27  ;;  %v1511_v32 = vld [vmem:[%s3514_s3 + $0x48] sm:$0xff]  ;;  %v103_v33 = vld [vmem:[%s3515_s1 + $0x20] sm:$0xff]  ;;  %v105_v34 = vld [vmem:[%s3515_s1 + $0x30] sm:$0xff] }
  0x18   :  { %222 = vmatpush.bf16.msra.mxu0 %v77_v4  ;;  %v153_v35 = vpack.c.bf16 %v105_v34, %v103_v33  ;;  %v1518_v36 = vld [vmem:[%s3514_s3 + $0x80] sm:$0xff]  ;;  %v108_v37 = vld [vmem:[%s3515_s1 + $0x48] sm:$0xff]  ;;  %v110_v38 = vld [vmem:[%s3515_s1 + $0x58] sm:$0xff] }
  0x19   :  { %370 = vmatpush.bf16.msra.mxu2 %v78_v5  ;;  %298 = vmatpush.bf16.msra.mxu1 %v89_v8  ;;  %v1514_v39 = vld [vmem:[%s3514_s3 + $0x60] sm:$0xff]  ;;  %v156_v40 = vpack.c.bf16 %v110_v38, %v108_v37  ;;  %v1521_v41 = vld [vmem:[%s3514_s3 + $0x98] sm:$0xff]  ;;  %v109_v44 = vld [vmem:[%s3515_s1 + $0x50] sm:$0xff] }
  0x1a   :  { %1779 = vmatmul.msk.bf16.vlgmr.msra.gmra.mxu3 %vm177_vm0, %v152_v10  ;;  %v1517_v42 = vld [vmem:[%s3514_s3 + $0x78] sm:$0xff]  ;;  %v107_v43 = vld [vmem:[%s3515_s1 + $0x40] sm:$0xff]  ;;  %v1524_v46 = vld [vmem:[%s3514_s3 + $0xb0] sm:$0xff] }
  0x1b   :  { %1565 = vperm.xlu0 %1794, %v1509_v19   ;;  %v155_v45 = vpack.c.bf16 %v109_v44, %v107_v43  ;;  %v112_v47 = vld [vmem:[%s3515_s1 + $0x68] sm:$0xff]  ;;  %v114_v48 = vld [vmem:[%s3515_s1 + $0x78] sm:$0xff]  ;;  %v1520_v49 = vld [vmem:[%s3514_s3 + $0x90] sm:$0xff] }
  0x1c   :  { %223 = vmatpush.bf16.msra.mxu0 %v75_v13  ;;  %1766 = vmatmul.msk.bf16.vlgmr.msra.gmra.mxu1 %vm177_vm0, %v152_v10  ;;  %v158_v50 = vpack.c.bf16 %v114_v48, %v112_v47  ;;  %v1523_v51 = vld [vmem:[%s3514_s3 + $0xa8] sm:$0xff]  ;;  %v111_v52 = vld [vmem:[%s3515_s1 + $0x60] sm:$0xff]  ;;  %v113_v53 = vld [vmem:[%s3515_s1 + $0x70] sm:$0xff] }
  0x1d   :  { %371 = vmatpush.bf16.msra.mxu2 %v76_v14  ;;  %1545 = vperm.xlu1 %1793, %v1505_v20   ;;  %v1504_v54 = vld [vmem:[%s3514_s3 + $0x10] sm:$0xff]  ;;  %v157_v55 = vpack.c.bf16 %v113_v53, %v111_v52  ;;  %v116_v56 = vld [vmem:[%s3515_s1 + $0x88] sm:$0xff]  ;;  %v118_v57 = vld [vmem:[%s3515_s1 + $0x98] sm:$0xff] }
  0x1e   :  { %1540 = vperm.xlu2 %1795, %v1504_v54   ;;  %v1507_v58 = vld [vmem:[%s3514_s3 + $0x28] sm:$0xff]  ;;  %v160_v59 = vpack.c.bf16 %v118_v57, %v116_v56  ;;  %v115_v60 = vld [vmem:[%s3515_s1 + $0x80] sm:$0xff]  ;;  %v117_v61 = vld [vmem:[%s3515_s1 + $0x90] sm:$0xff] }
  0x1f   :  { %v1510_v62 = vld [vmem:[%s3514_s3 + $0x40] sm:$0xff]  ;;  %v159_v63 = vpack.c.bf16 %v117_v61, %v115_v60  ;;  %v120_v0 = vld [vmem:[%s3515_s1 + $0xa8] sm:$0xff]  ;;  %v122_v1 = vld [vmem:[%s3515_s1 + $0xb8] sm:$0xff] }
  0x20   :  { %224 = vmatpush.bf16.msra.mxu0 %v73_v21  ;;  %v1513_v2 = vld [vmem:[%s3514_s3 + $0x58] sm:$0xff]  ;;  %v162_v3 = vpack.c.bf16 %v122_v1, %v120_v0  ;;  %v119_v4 = vld [vmem:[%s3515_s1 + $0xa0] sm:$0xff]  ;;  %v121_v5 = vld [vmem:[%s3515_s1 + $0xb0] sm:$0xff] }
  0x21   :  { %372 = vmatpush.bf16.msra.mxu2 %v74_v24  ;;  %v1516_v6 = vld [vmem:[%s3514_s3 + $0x70] sm:$0xff]  ;;  %v161_v7 = vpack.c.bf16 %v121_v5, %v119_v4  ;;  %v124_v8 = vld [vmem:[%s3515_s1 + $0xc8] sm:$0xff]  ;;  %v126_v9 = vld [vmem:[%s3515_s1 + $0xd8] sm:$0xff] }
  0x22   :  { %v1519_v10 = vld [vmem:[%s3514_s3 + $0x88] sm:$0xff]  ;;  %v164_v11 = vpack.c.bf16 %v126_v9, %v124_v8  ;;  %v123_v12 = vld [vmem:[%s3515_s1 + $0xc0] sm:$0xff]  ;;  %v125_v13 = vld [vmem:[%s3515_s1 + $0xd0] sm:$0xff] }
  0x23   :  { %225 = vmatmul.bf16.vlgmr.msra.gmra.mxu0 %v151_v25  ;;  %1580 = vperm.xlu0 %1794, %v1512_v26   ;;  %v163_v14 = vpack.c.bf16 %v125_v13, %v123_v12  ;;  %v1522_v15 = vld [vmem:[%s3514_s3 + $0xa0] sm:$0xff]  ;;  %v128_v16 = vld [vmem:[%s3515_s1 + $0xe8] sm:$0xff]  ;;  %v130_v17 = vld [vmem:[%s3515_s1 + $0xf8] sm:$0xff] }
  0x24   :  { %373 = vmatmul.bf16.vlgmr.msra.gmra.mxu2 %v151_v25  ;;  %v166_v18 = vpack.c.bf16 %v130_v17, %v128_v16  ;;  %v127_v19 = vld [vmem:[%s3515_s1 + $0xe0] sm:$0xff]  ;;  %v129_v20 = vld [vmem:[%s3515_s1 + $0xf0] sm:$0xff]  ;;  %v132_v22 = vld [vmem:[%s3515_s1 + $0x108] sm:$0xff] }
  0x25   :  { %1560 = vperm.xlu1 %1793, %v1508_v29   ;;  %v165_v21 = vpack.c.bf16 %v129_v20, %v127_v19  ;;  %v134_v23 = vld [vmem:[%s3515_s1 + $0x118] sm:$0xff]  ;;  %v131_v26 = vld [vmem:[%s3515_s1 + $0x100] sm:$0xff]  ;;  %v133_v27 = vld [vmem:[%s3515_s1 + $0x110] sm:$0xff] }
  0x26   :  { %1555 = vperm.xlu2 %1795, %v1507_v58   ;;  %v168_v24 = vpack.c.bf16 %v134_v23, %v132_v22  ;;  %v167_v29 = vpack.c.bf16 %v133_v27, %v131_v26  ;;  %v138_v33 = vld [vmem:[%s3515_s1 + $0x138] sm:$0xff]  ;;  %v135_v43 = vld [vmem:[%s3515_s1 + $0x120] sm:$0xff]  ;;  %v137_v44 = vld [vmem:[%s3515_s1 + $0x130] sm:$0xff] }
  0x27   :  { %v169_v47 = vpack.c.bf16 %v137_v44, %v135_v43  ;;  %v140_v54 = vld [vmem:[%s3515_s1 + $0x148] sm:$0xff]  ;;  %v146_v13 = vld [vmem:[%s3515_s1 + $0x178] sm:$0xff] }
  0x28   :  { %v144_v12 = vld [vmem:[%s3515_s1 + $0x168] sm:$0xff] }
  0x2a   :  { %1780 = vmatmul.msk.bf16.gmra.mxu3 %vm177_vm0, %v154_v30 }
  0x2b   :  { %1595 = vperm.xlu0 %1794, %v1515_v31  }
  0x2c   :  { %1767 = vmatmul.msk.bf16.gmra.mxu1 %vm177_vm0, %v154_v30 }
  0x2d   :  { %1575 = vperm.xlu1 %1793, %v1511_v32   ;;  %v136_v32 = vld [vmem:[%s3515_s1 + $0x128] sm:$0xff] }
  0x2e   :  { %1570 = vperm.xlu2 %1795, %v1510_v62  }
  0x33   :  { %230 = vmatmul.bf16.gmra.mxu0 %v153_v35  ;;  %1610 = vperm.xlu0 %1794, %v1518_v36  }
  0x34   :  { %378 = vmatmul.bf16.gmra.mxu2 %v153_v35  ;;  %v170_v35 = vpack.c.bf16 %v138_v33, %v136_v32 }
  0x35   :  { %1590 = vperm.xlu1 %1793, %v1514_v39  }
  0x36   :  { %1585 = vperm.xlu2 %1795, %v1513_v2   ;;  %v139_v2 = vld [vmem:[%s3515_s1 + $0x140] sm:$0xff] }
  0x3a   :  { %1781 = vmatmul.msk.bf16.gmra.mxu3 %vm177_vm0, %v156_v40 }
  0x3b   :  { %1625 = vperm.xlu0 %1794, %v1521_v41  }
  0x3c   :  { %1768 = vmatmul.msk.bf16.gmra.mxu1 %vm177_vm0, %v156_v40 }
  0x3d   :  { %1605 = vperm.xlu1 %1793, %v1517_v42  }
  0x3e   :  { %1600 = vperm.xlu2 %1795, %v1516_v6  }
  0x43   :  { %235 = vmatmul.bf16.gmra.mxu0 %v155_v45  ;;  %1640 = vperm.xlu0 %1794, %v1524_v46  }
  0x44   :  { %383 = vmatmul.bf16.gmra.mxu2 %v155_v45 }
  0x45   :  { %1620 = vperm.xlu1 %1793, %v1520_v49  }
  0x46   :  { %1615 = vperm.xlu2 %1795, %v1519_v10  }
  0x4a   :  { %1782 = vmatmul.msk.bf16.gmra.mxu3 %vm177_vm0, %v158_v50 }
  0x4c   :  { %1769 = vmatmul.msk.bf16.gmra.mxu1 %vm177_vm0, %v158_v50 }
  0x4d   :  { %1635 = vperm.xlu1 %1793, %v1523_v51  }
  0x4e   :  { %1630 = vperm.xlu2 %1795, %v1522_v15   ;;  %v174_v15 = vpack.c.bf16 %v146_v13, %v144_v12 }
  0x53   :  { %240 = vmatmul.bf16.gmra.mxu0 %v157_v55 }
  0x54   :  { %388 = vmatmul.bf16.gmra.mxu2 %v157_v55  ;;  %v142_v55 = vld [vmem:[%s3515_s1 + $0x158] sm:$0xff] }
  0x55   :  { %v172_v57 = vpack.c.bf16 %v142_v55, %v140_v54 }
  0x5a   :  { %1783 = vmatmul.msk.bf16.gmra.mxu3 %vm177_vm0, %v160_v59 }
  0x5c   :  { %1770 = vmatmul.msk.bf16.gmra.mxu1 %vm177_vm0, %v160_v59 }
  0x63   :  { %245 = vmatmul.bf16.gmra.mxu0 %v159_v63 }
  0x64   :  { %393 = vmatmul.bf16.gmra.mxu2 %v159_v63 }
  0x6a   :  { %1784 = vmatmul.msk.bf16.gmra.mxu3 %vm177_vm0, %v162_v3 }
  0x6c   :  { %1771 = vmatmul.msk.bf16.gmra.mxu1 %vm177_vm0, %v162_v3  ;;  %v141_v3 = vld [vmem:[%s3515_s1 + $0x150] sm:$0xff] }
  0x73   :  { %250 = vmatmul.bf16.gmra.mxu0 %v161_v7 }
  0x74   :  { %398 = vmatmul.bf16.gmra.mxu2 %v161_v7  ;;  %v171_v7 = vpack.c.bf16 %v141_v3, %v139_v2 }
  0x7a   :  { %1785 = vmatmul.msk.bf16.gmra.mxu3 %vm177_vm0, %v164_v11 }
  0x7c   :  { %1772 = vmatmul.msk.bf16.gmra.mxu1 %vm177_vm0, %v164_v11 }
  0x7d   :  { %v2311_v32 = vpop.permute.xlu0 %1535 }
  0x83   :  { %255 = vmatmul.bf16.gmra.mxu0 %v163_v14 }
  0x84   :  { %403 = vmatmul.bf16.gmra.mxu2 %v163_v14 }
  0x8a   :  { %1786 = vmatmul.msk.bf16.gmra.mxu3 %vm177_vm0, %v166_v18 }
  0x8c   :  { %1773 = vmatmul.msk.bf16.gmra.mxu1 %vm177_vm0, %v166_v18 }
  0x93   :  { %260 = vmatmul.bf16.gmra.mxu0 %v165_v21 }
  0x94   :  { %408 = vmatmul.bf16.gmra.mxu2 %v165_v21 }
  0x99   :  { %v300_v25 = vpop.f32.mrf.mxu1 }
  0x9a   :  { %1787 = vmatmul.msk.bf16.gmra.mxu3 %vm177_vm0, %v168_v24 }
  0x9c   :  { %1774 = vmatmul.msk.bf16.gmra.mxu1 %vm177_vm0, %v168_v24  ;;  %v143_v24 = vld [vmem:[%s3515_s1 + $0x160] sm:$0xff] }
  0x9d   :  { %v448_v28 = vpop.f32.mrf.mxu3 }
  0xa0   :  { %v226_v30 = vpop.f32.mrf.mxu0 }
  0xa1   :  { %v302_v31 = vpop.f32.mrf.mxu1  ;;  %v2236_v36 = vadd.f32 %v300_v25, %v226_v30  ;;  %v145_v25 = vld [vmem:[%s3515_s1 + $0x170] sm:$0xff] }
  0xa3   :  { %265 = vmatmul.bf16.gmra.mxu0 %v167_v29 }
  0xa4   :  { %413 = vmatmul.bf16.gmra.mxu2 %v167_v29  ;;  %v173_v29 = vpack.c.bf16 %v145_v25, %v143_v24 }
  0xa5   :  { %v450_v34 = vpop.f32.mrf.mxu3 }
  0xa7   :  { %v374_v37 = vpop.f32.mrf.mxu2 }
  0xa8   :  { %v2238_v38 = vadd.f32 %v448_v28, %v374_v37  ;;  %v228_v39 = vpop.f32.mrf.mxu0  ;;  %v150_v37 = vld [vmem:[%s3515_s1 + $0x198] sm:$0xff] }
  0xa9   :  { %v305_v40 = vpop.f32.mrf.mxu1  ;;  %v2253_v50 = vadd.f32 %v302_v31, %v228_v39 }
  0xaa   :  { %1788 = vmatmul.msk.bf16.gmra.mxu3 %vm177_vm0, %v170_v35  ;;  %v514_v41 = vsel %vm513_vm1, %v2238_v38, 0.0 }
  0xab   :  { %v515_v42 = vadd.f32 %v514_v41, %v2236_v36 }
  0xac   :  { %1775 = vmatmul.msk.bf16.gmra.mxu1 %vm177_vm0, %v170_v35  ;;  %v148_v35 = vld [vmem:[%s3515_s1 + $0x188] sm:$0xff] }
  0xad   :  { %516 = vadd.xlane.f32.xlu0 %v515_v42  ;;  %v453_v45 = vpop.f32.mrf.mxu3 }
  0xaf   :  { %v376_v46 = vpop.f32.mrf.mxu2 }
  0xb0   :  { %v2251_v48 = vadd.f32 %v450_v34, %v376_v46  ;;  %v231_v49 = vpop.f32.mrf.mxu0 }
  0xb1   :  { %v307_v51 = vpop.f32.mrf.mxu1  ;;  %v2264_v58 = vadd.f32 %v305_v40, %v231_v49  ;;  %v176_v40 = vpack.c.bf16 %v150_v37, %v148_v35  ;;  %v2330_v49 = vpop.permute.xlu0 %1550 }
  0xb2   :  { %v518_v52 = vsel %vm513_vm1, %v2251_v48, 0.0  ;;  %3564 = vst [vmem:[#allocation2_spill] sm:$0xff] %v2330_v49  ;;  %v2378_v37 = vpop.permute.xlu2 %1540 }
  0xb3   :  { %270 = vmatmul.bf16.gmra.mxu0 %v169_v47  ;;  %v519_v53 = vadd.f32 %v518_v52, %v2253_v50  ;;  %v147_v52 = vld [vmem:[%s3515_s1 + $0x180] sm:$0xff] }
  0xb4   :  { %418 = vmatmul.bf16.gmra.mxu2 %v169_v47 }
  0xb5   :  { %520 = vadd.xlane.f32.xlu0 %v519_v53  ;;  %v455_v56 = vpop.f32.mrf.mxu3  ;;  %v149_v53 = vld [vmem:[%s3515_s1 + $0x190] sm:$0xff] }
  0xb7   :  { %v379_v59 = vpop.f32.mrf.mxu2 }
  0xb8   :  { %v2266_v60 = vadd.f32 %v453_v45, %v379_v59  ;;  %v233_v61 = vpop.f32.mrf.mxu0  ;;  %v2341_v59 = vpop.permute.xlu1 %1530 }
  0xb9   :  { %v310_v62 = vpop.f32.mrf.mxu1  ;;  %v2281_v8 = vadd.f32 %v307_v51, %v233_v61  ;;  %v2348_v2 = vpop.permute.xlu0 %1565 }
  0xba   :  { %v522_v63 = vsel %vm513_vm1, %v2266_v60, 0.0  ;;  %1789 = vmatmul.msk.bf16.gmra.mxu3 %vm177_vm0, %v172_v57  ;;  %3565 = vst [vmem:[#allocation3_spill] sm:$0xff] %v2348_v2 }
  0xbb   :  { %v523_v0 = vadd.f32 %v522_v63, %v2264_v58 }
  0xbc   :  { %1776 = vmatmul.msk.bf16.gmra.mxu1 %vm177_vm0, %v172_v57  ;;  %v175_v57 = vpack.c.bf16 %v149_v53, %v147_v52 }
  0xbd   :  { %524 = vadd.xlane.f32.xlu1 %v523_v0  ;;  %v458_v1 = vpop.f32.mrf.mxu3 }
  0xbf   :  { %v381_v4 = vpop.f32.mrf.mxu2 }
  0xc0   :  { %v2279_v5 = vadd.f32 %v455_v56, %v381_v4  ;;  %v236_v6 = vpop.f32.mrf.mxu0 }
  0xc1   :  { %v312_v9 = vpop.f32.mrf.mxu1  ;;  %v2292_v16 = vadd.f32 %v310_v62, %v236_v6 }
  0xc2   :  { %v526_v10 = vsel %vm513_vm1, %v2279_v5, 0.0 }
  0xc3   :  { %v527_v11 = vadd.f32 %v526_v10, %v2281_v8  ;;  %275 = vmatmul.bf16.gmra.mxu0 %v171_v7 }
  0xc4   :  { %423 = vmatmul.bf16.gmra.mxu2 %v171_v7 }
  0xc5   :  { %528 = vadd.xlane.f32.xlu1 %v527_v11  ;;  %v460_v14 = vpop.f32.mrf.mxu3  ;;  %v2356_v11 = vpop.permute.xlu1 %1545 }
  0xc7   :  { %v384_v17 = vpop.f32.mrf.mxu2 }
  0xc8   :  { %v2294_v18 = vadd.f32 %v458_v1, %v384_v17  ;;  %v238_v19 = vpop.f32.mrf.mxu0 }
  0xc9   :  { %v315_v20 = vpop.f32.mrf.mxu1  ;;  %v2309_v30 = vadd.f32 %v312_v9, %v238_v19 }
  0xca   :  { %v530_v21 = vsel %vm513_vm1, %v2294_v18, 0.0  ;;  %1790 = vmatmul.msk.bf16.gmra.mxu3 %vm177_vm0, %v174_v15 }
  0xcb   :  { %v531_v22 = vadd.f32 %v530_v21, %v2292_v16 }
  0xcc   :  { %1777 = vmatmul.msk.bf16.gmra.mxu1 %vm177_vm0, %v174_v15  ;;  %v2359_v15 = vpop.permute.xlu0 %1580 }
  0xcd   :  { %532 = vadd.xlane.f32.xlu2 %v531_v22  ;;  %v463_v23 = vpop.f32.mrf.mxu3  ;;  %3566 = vst [vmem:[#allocation4_spill] sm:$0xff] %v2359_v15  ;;  %v2368_v24 = vpop.permute.xlu1 %1560 }
  0xce   :  { %3567 = vst [vmem:[#allocation5_spill] sm:$0xff] %v2368_v24 }
  0xcf   :  { %v386_v26 = vpop.f32.mrf.mxu2 }
  0xd0   :  { %v2307_v27 = vadd.f32 %v460_v14, %v386_v26  ;;  %v241_v28 = vpop.f32.mrf.mxu0 }
  0xd1   :  { %v317_v31 = vpop.f32.mrf.mxu1  ;;  %v2322_v41 = vadd.f32 %v315_v20, %v241_v28 }
  0xd2   :  { %v534_v33 = vsel %vm513_vm1, %v2307_v27, 0.0 }
  0xd3   :  { %v535_v34 = vadd.f32 %v534_v33, %v2309_v30  ;;  %280 = vmatmul.bf16.gmra.mxu0 %v173_v29 }
  0xd4   :  { %428 = vmatmul.bf16.gmra.mxu2 %v173_v29 }
  0xd5   :  { %536 = vadd.xlane.f32.xlu2 %v535_v34  ;;  %v465_v39 = vpop.f32.mrf.mxu3  ;;  %v2374_v34 = vpop.permute.xlu0 %1595 }
  0xd6   :  { %3568 = vst [vmem:[#allocation6_spill] sm:$0xff] %v2374_v34 }
  0xd7   :  { %v389_v42 = vpop.f32.mrf.mxu2 }
  0xd8   :  { %v2324_v43 = vadd.f32 %v463_v23, %v389_v42  ;;  %v243_v44 = vpop.f32.mrf.mxu0  ;;  %v2381_v42 = vpop.permute.xlu1 %1575 }
  0xd9   :  { %v320_v45 = vpop.f32.mrf.mxu1  ;;  %v2343_v61 = vadd.f32 %v317_v31, %v243_v44  ;;  %3569 = vst [vmem:[#allocation7_spill] sm:$0xff] %v2381_v42 }
  0xda   :  { %v538_v46 = vsel %vm513_vm1, %v2324_v43, 0.0  ;;  %1791 = vmatmul.msk.bf16.gmra.mxu3 %vm177_vm0, %v176_v40 }
  0xdb   :  { %v539_v47 = vadd.f32 %v538_v46, %v2322_v41 }
  0xdc   :  { %1778 = vmatmul.msk.bf16.gmra.mxu1 %vm177_vm0, %v176_v40 }
  0xdd   :  { %540 = vadd.xlane.f32.xlu0 %v539_v47  ;;  %v468_v51 = vpop.f32.mrf.mxu3 }
  0xdf   :  { %v391_v54 = vpop.f32.mrf.mxu2 }
  0xe0   :  { %v2339_v55 = vadd.f32 %v465_v39, %v391_v54  ;;  %v246_v56 = vpop.f32.mrf.mxu0  ;;  %v2390_v54 = vpop.permute.xlu0 %1610 }
  0xe1   :  { %v322_v62 = vpop.f32.mrf.mxu1  ;;  %v2350_v3 = vadd.f32 %v320_v45, %v246_v56  ;;  %3570 = vst [vmem:[#allocation8_spill] sm:$0xff] %v2390_v54  ;;  %v2392_v56 = vpop.permute.xlu2 %1555 }
  0xe2   :  { %v542_v63 = vsel %vm513_vm1, %v2339_v55, 0.0  ;;  %3571 = vst [vmem:[#allocation9_spill] sm:$0xff] %v2392_v56 }
  0xe3   :  { %v543_v0 = vadd.f32 %v542_v63, %v2343_v61  ;;  %285 = vmatmul.bf16.gmra.mxu0 %v175_v57 }
  0xe4   :  { %433 = vmatmul.bf16.gmra.mxu2 %v175_v57 }
  0xe5   :  { %544 = vadd.xlane.f32.xlu1 %v543_v0  ;;  %v470_v1 = vpop.f32.mrf.mxu3 }
  0xe7   :  { %v394_v4 = vpop.f32.mrf.mxu2 }
  0xe8   :  { %v2352_v6 = vadd.f32 %v468_v51, %v394_v4  ;;  %v248_v7 = vpop.f32.mrf.mxu0  ;;  %v2398_v4 = vpop.permute.xlu1 %1590 }
  0xe9   :  { %v325_v9 = vpop.f32.mrf.mxu1  ;;  %v2363_v20 = vadd.f32 %v322_v62, %v248_v7  ;;  %3572 = vst [vmem:[#allocation10_spill] sm:$0xff] %v2398_v4 }
  0xea   :  { %v546_v10 = vsel %vm513_vm1, %v2352_v6, 0.0 }
  0xeb   :  { %v547_v12 = vadd.f32 %v546_v10, %v2350_v3 }
  0xed   :  { %548 = vadd.xlane.f32.xlu2 %v547_v12  ;;  %v473_v13 = vpop.f32.mrf.mxu3 }
  0xef   :  { %v396_v14 = vpop.f32.mrf.mxu2 }
  0xf0   :  { %v2361_v17 = vadd.f32 %v470_v1, %v396_v14  ;;  %v251_v19 = vpop.f32.mrf.mxu0  ;;  %v2405_v14 = vpop.permute.xlu2 %1570 }
  0xf1   :  { %v327_v21 = vpop.f32.mrf.mxu1  ;;  %v2370_v26 = vadd.f32 %v325_v9, %v251_v19  ;;  %3574 = vst [vmem:[#allocation12_spill] sm:$0xff] %v2405_v14 }
  0xf2   :  { %v550_v22 = vsel %vm513_vm1, %v2361_v17, 0.0 }
  0xf3   :  { %v551_v23 = vadd.f32 %v550_v22, %v2363_v20 }
  0xf5   :  { %552 = vadd.xlane.f32.xlu0 %v551_v23  ;;  %v475_v25 = vpop.f32.mrf.mxu3 }
  0xf7   :  { %v399_v28 = vpop.f32.mrf.mxu2 }
  0xf8   :  { %v2372_v29 = vadd.f32 %v473_v13, %v399_v28  ;;  %v253_v31 = vpop.f32.mrf.mxu0  ;;  %v2403_v13 = vpop.permute.xlu0 %1625 }
  0xf9   :  { %v330_v33 = vpop.f32.mrf.mxu1  ;;  %v2385_v47 = vadd.f32 %v327_v21, %v253_v31  ;;  %3573 = vst [vmem:[#allocation11_spill] sm:$0xff] %v2403_v13  ;;  %v2413_v31 = vpop.permute.xlu1 %1605 }
  0xfa   :  { %v554_v35 = vsel %vm513_vm1, %v2372_v29, 0.0  ;;  %3575 = vst [vmem:[#allocation13_spill] sm:$0xff] %v2413_v31 }
  0xfb   :  { %v555_v39 = vadd.f32 %v554_v35, %v2370_v26 }
  0xfd   :  { %556 = vadd.xlane.f32.xlu1 %v555_v39  ;;  %v478_v40 = vpop.f32.mrf.mxu3 }
  0xff   :  { %v401_v44 = vpop.f32.mrf.mxu2 }
 0x100   :  { %v2383_v45 = vadd.f32 %v475_v25, %v401_v44  ;;  %v256_v46 = vpop.f32.mrf.mxu0  ;;  %v2418_v44 = vpop.permute.xlu0 %1640 }
 0x101   :  { %v332_v51 = vpop.f32.mrf.mxu1  ;;  %v2394_v62 = vadd.f32 %v330_v33, %v256_v46  ;;  %3576 = vst [vmem:[#allocation14_spill] sm:$0xff] %v2418_v44 }
 0x102   :  { %v558_v52 = vsel %vm513_vm1, %v2383_v45, 0.0 }
 0x103   :  { %v559_v53 = vadd.f32 %v558_v52, %v2385_v47 }
 0x105   :  { %560 = vadd.xlane.f32.xlu2 %v559_v53  ;;  %v480_v57 = vpop.f32.mrf.mxu3 }
 0x107   :  { %v404_v63 = vpop.f32.mrf.mxu2 }
 0x108   :  { %v2396_v0 = vadd.f32 %v478_v40, %v404_v63  ;;  %v258_v1 = vpop.f32.mrf.mxu0 }
 0x109   :  { %v335_v7 = vpop.f32.mrf.mxu1  ;;  %v2409_v23 = vadd.f32 %v332_v51, %v258_v1  ;;  %v2422_v51 = vpop.permute.xlu2 %1585 }
 0x10a   :  { %v562_v9 = vsel %vm513_vm1, %v2396_v0, 0.0  ;;  %3577 = vst [vmem:[#allocation15_spill] sm:$0xff] %v2422_v51  ;;  %v2427_v1 = vpop.permute.xlu1 %1620 }
 0x10b   :  { %v563_v10 = vadd.f32 %v562_v9, %v2394_v62  ;;  %3578 = vst [vmem:[#allocation16_spill] sm:$0xff] %v2427_v1 }
 0x10d   :  { %564 = vadd.xlane.f32.xlu0 %v563_v10  ;;  %v483_v12 = vpop.f32.mrf.mxu3 }
 0x10f   :  { %v406_v19 = vpop.f32.mrf.mxu2 }
 0x110   :  { %v2407_v21 = vadd.f32 %v480_v57, %v406_v19  ;;  %v261_v22 = vpop.f32.mrf.mxu0 }
 0x111   :  { %v337_v25 = vpop.f32.mrf.mxu1  ;;  %v2416_v39 = vadd.f32 %v335_v7, %v261_v22  ;;  %v2435_v44 = vpop.permute.xlu2 %1600 }
 0x112   :  { %v566_v28 = vsel %vm513_vm1, %v2407_v21, 0.0  ;;  %3579 = vst [vmem:[#allocation17_spill] sm:$0xff] %v2435_v44 }
 0x113   :  { %v567_v33 = vadd.f32 %v566_v28, %v2409_v23 }
 0x115   :  { %568 = vadd.xlane.f32.xlu1 %v567_v33  ;;  %v485_v35 = vpop.f32.mrf.mxu3 }
 0x117   :  { %v409_v40 = vpop.f32.mrf.mxu2 }
 0x118   :  { %v2420_v46 = vadd.f32 %v483_v12, %v409_v40  ;;  %v263_v52 = vpop.f32.mrf.mxu0 }
 0x119   :  { %v340_v53 = vpop.f32.mrf.mxu1  ;;  %v2431_v12 = vadd.f32 %v337_v25, %v263_v52 }
 0x11a   :  { %v570_v57 = vsel %vm513_vm1, %v2420_v46, 0.0 }
 0x11b   :  { %v571_v63 = vadd.f32 %v570_v57, %v2416_v39 }
 0x11d   :  { %572 = vadd.xlane.f32.xlu2 %v571_v63  ;;  %v488_v9 = vpop.f32.mrf.mxu3 }
 0x11f   :  { %v411_v7 = vpop.f32.mrf.mxu2 }
 0x120   :  { %v2429_v10 = vadd.f32 %v485_v35, %v411_v7  ;;  %v517_v19 = vpop.xlane.xlu0 %516  ;;  %v266_v22 = vpop.f32.mrf.mxu0 }
 0x121   :  { %v618_v28 = vmul.f32 0.0051020407, %v517_v19  ;;  %v342_v33 = vpop.f32.mrf.mxu1  ;;  %v2448_v19 = vpop.permute.xlu1 %1635  ;;  %v2450_v13 = vadd.f32 %v340_v53, %v266_v22 }
 0x122   :  { %v574_v40 = vsel %vm513_vm1, %v2429_v10, 0.0  ;;  %3580 = vst [vmem:[#allocation18_spill] sm:$0xff] %v2448_v19 }
 0x123   :  { %v2438_v57 = vsub.f32 %v2236_v36, %v618_v28  ;;  %v2441_v63 = vsub.f32 %v2238_v38, %v618_v28  ;;  %v575_v35 = vadd.f32 %v574_v40, %v2431_v12 }
 0x125   :  { %576 = vadd.xlane.f32.xlu0 %v575_v35  ;;  %v490_v7 = vpop.f32.mrf.mxu3  ;;  %v696_v25 = vmul.f32 %v2438_v57, %v2438_v57  ;;  %v697_v52 = vmul.f32 %v2441_v63, %v2441_v63 }
 0x127   :  { %v414_v44 = vpop.f32.mrf.mxu2  ;;  %v748_v36 = vsel %vm513_vm1, %v697_v52, 0.0  ;;  %v2464_v52 = vpop.permute.xlu2 %1615 }
 0x128   :  { %v2453_v54 = vadd.f32 %v488_v9, %v414_v44  ;;  %v521_v38 = vpop.xlane.xlu0 %520  ;;  %v268_v28 = vpop.f32.mrf.mxu0  ;;  %v749_v40 = vadd.f32 %v748_v36, %v696_v25  ;;  %3581 = vst [vmem:[#allocation19_spill] sm:$0xff] %v2464_v52 }
 0x129   :  { %v619_v35 = vmul.f32 0.0051020407, %v521_v38  ;;  %v345_v51 = vpop.f32.mrf.mxu1  ;;  %v2473_v19 = vadd.f32 %v342_v33, %v268_v28 }
 0x12a   :  { %750 = vadd.xlane.f32.xlu2 %v749_v40  ;;  %v578_v34 = vsel %vm513_vm1, %v2453_v54, 0.0 }
 0x12b   :  { %v2458_v14 = vsub.f32 %v2253_v50, %v619_v35  ;;  %v2461_v53 = vsub.f32 %v2251_v48, %v619_v35  ;;  %v579_v22 = vadd.f32 %v578_v34, %v2450_v13 }
 0x12d   :  { %580 = vadd.xlane.f32.xlu1 %v579_v22  ;;  %v493_v44 = vpop.f32.mrf.mxu3  ;;  %v698_v9 = vmul.f32 %v2458_v14, %v2458_v14  ;;  %v699_v25 = vmul.f32 %v2461_v53, %v2461_v53 }
 0x12f   :  { %v416_v36 = vpop.f32.mrf.mxu2  ;;  %v752_v38 = vsel %vm513_vm1, %v699_v25, 0.0 }
 0x130   :  { %v2471_v50 = vadd.f32 %v490_v7, %v416_v36  ;;  %v525_v40 = vpop.xlane.xlu1 %524  ;;  %v271_v48 = vpop.f32.mrf.mxu0  ;;  %v753_v35 = vadd.f32 %v752_v38, %v698_v9 }
 0x131   :  { %v620_v34 = vmul.f32 0.0051020407, %v525_v40  ;;  %v347_v52 = vpop.f32.mrf.mxu1  ;;  %v2488_v9 = vpop.permute.xlu2 %1630  ;;  %v2490_v36 = vadd.f32 %v345_v51, %v271_v48 }
 0x132   :  { %754 = vadd.xlane.f32.xlu0 %v753_v35  ;;  %v582_v22 = vsel %vm513_vm1, %v2471_v50, 0.0  ;;  %3582 = vst [vmem:[#allocation20_spill] sm:$0xff] %v2488_v9 }
 0x133   :  { %v2478_v15 = vsub.f32 %v2264_v58, %v620_v34  ;;  %v2481_v24 = vsub.f32 %v2266_v60, %v620_v34  ;;  %v583_v7 = vadd.f32 %v582_v22, %v2473_v19 }
 0x135   :  { %584 = vadd.xlane.f32.xlu2 %v583_v7  ;;  %v495_v25 = vpop.f32.mrf.mxu3  ;;  %v700_v33 = vmul.f32 %v2478_v15, %v2478_v15  ;;  %v701_v28 = vmul.f32 %v2481_v24, %v2481_v24 }
 0x137   :  { %v419_v38 = vpop.f32.mrf.mxu2  ;;  %v756_v58 = vsel %vm513_vm1, %v701_v28, 0.0 }
 0x138   :  { %v2493_v40 = vadd.f32 %v493_v44, %v419_v38  ;;  %v529_v60 = vpop.xlane.xlu1 %528  ;;  %v273_v35 = vpop.f32.mrf.mxu0  ;;  %v757_v34 = vadd.f32 %v756_v58, %v700_v33 }
 0x139   :  { %v621_v22 = vmul.f32 0.0051020407, %v529_v60  ;;  %v350_v7 = vpop.f32.mrf.mxu1 }
 0x13a   :  { %758 = vadd.xlane.f32.xlu1 %v757_v34  ;;  %v586_v2 = vsel %vm513_vm1, %v2493_v40, 0.0 }
 0x13b   :  { %v2498_v1 = vsub.f32 %v2281_v8, %v621_v22  ;;  %v2501_v51 = vsub.f32 %v2279_v5, %v621_v22  ;;  %v587_v48 = vadd.f32 %v586_v2, %v2490_v36  ;;  %v2511_v5 = vadd.f32 %v347_v52, %v273_v35 }
 0x13d   :  { %588 = vadd.xlane.f32.xlu0 %v587_v48  ;;  %v702_v44 = vmul.f32 %v2498_v1, %v2498_v1  ;;  %v703_v33 = vmul.f32 %v2501_v51, %v2501_v51  ;;  %v498_v28 = vpop.f32.mrf.mxu3 }
 0x13f   :  { %v421_v38 = vpop.f32.mrf.mxu2  ;;  %v760_v58 = vsel %vm513_vm1, %v703_v33, 0.0 }
 0x140   :  { %v2509_v60 = vadd.f32 %v495_v25, %v421_v38  ;;  %v533_v8 = vpop.xlane.xlu2 %532  ;;  %v761_v34 = vadd.f32 %v760_v58, %v702_v44  ;;  %v276_v9 = vpop.f32.mrf.mxu0 }
 0x141   :  { %v622_v22 = vmul.f32 0.0051020407, %v533_v8  ;;  %v352_v25 = vpop.f32.mrf.mxu1  ;;  %v2526_v58 = vadd.f32 %v350_v7, %v276_v9 }
 0x142   :  { %762 = vadd.xlane.f32.xlu2 %v761_v34  ;;  %v590_v2 = vsel %vm513_vm1, %v2509_v60, 0.0 }
 0x143   :  { %v2516_v48 = vsub.f32 %v2292_v16, %v622_v22  ;;  %v2519_v31 = vsub.f32 %v2294_v18, %v622_v22  ;;  %v591_v33 = vadd.f32 %v590_v2, %v2511_v5 }
 0x145   :  { %592 = vadd.xlane.f32.xlu1 %v591_v33  ;;  %v704_v44 = vmul.f32 %v2516_v48, %v2516_v48  ;;  %v705_v52 = vmul.f32 %v2519_v31, %v2519_v31  ;;  %v500_v35 = vpop.f32.mrf.mxu3 }
 0x147   :  { %v424_v38 = vpop.f32.mrf.mxu2  ;;  %v764_v16 = vsel %vm513_vm1, %v705_v52, 0.0 }
 0x148   :  { %v2529_v8 = vadd.f32 %v498_v28, %v424_v38  ;;  %v537_v18 = vpop.xlane.xlu2 %536  ;;  %v765_v34 = vadd.f32 %v764_v16, %v704_v44  ;;  %v278_v22 = vpop.f32.mrf.mxu0 }
 0x149   :  { %v623_v2 = vmul.f32 0.0051020407, %v537_v18  ;;  %v355_v44 = vpop.f32.mrf.mxu1  ;;  %v2544_v38 = vadd.f32 %v352_v25, %v278_v22 }
 0x14a   :  { %766 = vadd.xlane.f32.xlu0 %v765_v34  ;;  %v594_v33 = vsel %vm513_vm1, %v2529_v8, 0.0 }
 0x14b   :  { %v2534_v4 = vsub.f32 %v2309_v30, %v623_v2  ;;  %v2537_v42 = vsub.f32 %v2307_v27, %v623_v2  ;;  %v595_v9 = vadd.f32 %v594_v33, %v2526_v58 }
 0x14d   :  { %596 = vadd.xlane.f32.xlu2 %v595_v9  ;;  %v706_v7 = vmul.f32 %v2534_v4, %v2534_v4  ;;  %v707_v28 = vmul.f32 %v2537_v42, %v2537_v42  ;;  %v503_v30 = vpop.f32.mrf.mxu3 }
 0x14f   :  { %v426_v52 = vpop.f32.mrf.mxu2  ;;  %v768_v16 = vsel %vm513_vm1, %v707_v28, 0.0 }
 0x150   :  { %v2547_v18 = vadd.f32 %v500_v35, %v426_v52  ;;  %v541_v27 = vpop.xlane.xlu0 %540  ;;  %v769_v34 = vadd.f32 %v768_v16, %v706_v7  ;;  %v281_v2 = vpop.f32.mrf.mxu0 }
 0x151   :  { %v624_v33 = vmul.f32 0.0051020407, %v541_v27  ;;  %v2562_v28 = vadd.f32 %v355_v44, %v281_v2  ;;  %v357_v16 = vpop.f32.mrf.mxu1 }
 0x152   :  { %770 = vadd.xlane.f32.xlu1 %v769_v34  ;;  %v598_v9 = vsel %vm513_vm1, %v2547_v18, 0.0 }
 0x153   :  { %v2552_v49 = vsub.f32 %v2322_v41, %v624_v33  ;;  %v2555_v56 = vsub.f32 %v2324_v43, %v624_v33  ;;  %v599_v25 = vadd.f32 %v598_v9, %v2544_v38 }
 0x155   :  { %3583 = vst [vmem:[#allocation21_spill] sm:$0xff] %v2552_v49  ;;  %600 = vadd.xlane.f32.xlu0 %v599_v25  ;;  %v708_v35 = vmul.f32 %v2552_v49, %v2552_v49  ;;  %v709_v22 = vmul.f32 %v2555_v56, %v2555_v56  ;;  %v505_v9 = vpop.f32.mrf.mxu3 }
 0x156   :  { %3584 = vst [vmem:[#allocation22_spill] sm:$0xff] %v2555_v56 }
 0x157   :  { %v429_v7 = vpop.f32.mrf.mxu2  ;;  %v772_v52 = vsel %vm513_vm1, %v709_v22, 0.0 }
 0x158   :  { %v2565_v41 = vadd.f32 %v503_v30, %v429_v7  ;;  %v545_v27 = vpop.xlane.xlu1 %544  ;;  %v773_v43 = vadd.f32 %v772_v52, %v708_v35  ;;  %v283_v34 = vpop.f32.mrf.mxu0 }
 0x159   :  { %v625_v33 = vmul.f32 0.0051020407, %v545_v27  ;;  %v2580_v7 = vadd.f32 %v357_v16, %v283_v34 }
 0x15a   :  { %774 = vadd.xlane.f32.xlu2 %v773_v43  ;;  %v602_v25 = vsel %vm513_vm1, %v2565_v41, 0.0 }
 0x15b   :  { %v2570_v49 = vsub.f32 %v2343_v61, %v625_v33  ;;  %v2573_v44 = vsub.f32 %v2339_v55, %v625_v33  ;;  %v603_v2 = vadd.f32 %v602_v25, %v2562_v28  ;;  %v360_v25 = vpop.f32.mrf.mxu1 }
 0x15d   :  { %3585 = vst [vmem:[#allocation23_spill] sm:$0xff] %v2573_v44  ;;  %604 = vadd.xlane.f32.xlu1 %v603_v2  ;;  %v710_v30 = vmul.f32 %v2570_v49, %v2570_v49  ;;  %v711_v35 = vmul.f32 %v2573_v44, %v2573_v44  ;;  %v508_v34 = vpop.f32.mrf.mxu3 }
 0x15f   :  { %v431_v22 = vpop.f32.mrf.mxu2  ;;  %v776_v52 = vsel %vm513_vm1, %v711_v35, 0.0 }
 0x160   :  { %v2583_v27 = vadd.f32 %v505_v9, %v431_v22  ;;  %v549_v61 = vpop.xlane.xlu2 %548  ;;  %v777_v43 = vadd.f32 %v776_v52, %v710_v30  ;;  %v286_v2 = vpop.f32.mrf.mxu0 }
 0x161   :  { %v626_v55 = vmul.f32 0.0051020407, %v549_v61  ;;  %v2598_v22 = vadd.f32 %v360_v25, %v286_v2 }
 0x162   :  { %778 = vadd.xlane.f32.xlu0 %v777_v43  ;;  %v606_v33 = vsel %vm513_vm1, %v2583_v27, 0.0 }
 0x163   :  { %v2588_v56 = vsub.f32 %v2350_v3, %v626_v55  ;;  %v2591_v44 = vsub.f32 %v2352_v6, %v626_v55  ;;  %v607_v16 = vadd.f32 %v606_v33, %v2580_v7  ;;  %v362_v2 = vpop.f32.mrf.mxu1 }
 0x165   :  { %3586 = vst [vmem:[#allocation24_spill] sm:$0xff] %v2588_v56  ;;  %608 = vadd.xlane.f32.xlu2 %v607_v16  ;;  %v712_v9 = vmul.f32 %v2588_v56, %v2588_v56  ;;  %v713_v30 = vmul.f32 %v2591_v44, %v2591_v44 }
 0x166   :  { %3587 = vst [vmem:[#allocation25_spill] sm:$0xff] %v2591_v44 }
 0x167   :  { %v434_v35 = vpop.f32.mrf.mxu2  ;;  %v780_v52 = vsel %vm513_vm1, %v713_v30, 0.0 }
 0x168   :  { %v2601_v3 = vadd.f32 %v508_v34, %v434_v35  ;;  %v553_v61 = vpop.xlane.xlu0 %552  ;;  %v781_v6 = vadd.f32 %v780_v52, %v712_v9  ;;  %v288_v44 = vpop.f32.mrf.mxu0 }
 0x169   :  { %v627_v43 = vmul.f32 0.0051020407, %v553_v61  ;;  %v510_v34 = vpop.f32.mrf.mxu3  ;;  %v2616_v52 = vadd.f32 %v362_v2, %v288_v44 }
 0x16a   :  { %782 = vadd.xlane.f32.xlu1 %v781_v6  ;;  %v610_v55 = vsel %vm513_vm1, %v2601_v3, 0.0 }
 0x16b   :  { %v2606_v33 = vsub.f32 %v2363_v20, %v627_v43  ;;  %v2609_v16 = vsub.f32 %v2361_v17, %v627_v43  ;;  %v611_v25 = vadd.f32 %v610_v55, %v2598_v22 }
 0x16d   :  { %612 = vadd.xlane.f32.xlu0 %v611_v25  ;;  %v714_v9 = vmul.f32 %v2606_v33, %v2606_v33  ;;  %v715_v30 = vmul.f32 %v2609_v16, %v2609_v16 }
 0x16f   :  { %v436_v35 = vpop.f32.mrf.mxu2  ;;  %v784_v20 = vsel %vm513_vm1, %v715_v30, 0.0 }
 0x170   :  { %v2619_v61 = vadd.f32 %v510_v34, %v436_v35  ;;  %v557_v17 = vpop.xlane.xlu1 %556  ;;  %v785_v6 = vadd.f32 %v784_v20, %v714_v9 }
 0x171   :  { %v628_v43 = vmul.f32 0.0051020407, %v557_v17 }
 0x172   :  { %786 = vadd.xlane.f32.xlu2 %v785_v6  ;;  %v614_v55 = vsel %vm513_vm1, %v2619_v61, 0.0 }
 0x173   :  { %v2624_v25 = vsub.f32 %v2370_v26, %v628_v43  ;;  %v2627_v56 = vsub.f32 %v2372_v29, %v628_v43  ;;  %v615_v44 = vadd.f32 %v614_v55, %v2616_v52 }
 0x175   :  { %616 = vadd.xlane.f32.xlu1 %v615_v44  ;;  %v716_v2 = vmul.f32 %v2624_v25, %v2624_v25  ;;  %v717_v34 = vmul.f32 %v2627_v56, %v2627_v56 }
 0x177   :  { %v788_v9 = vsel %vm513_vm1, %v717_v34, 0.0 }
 0x178   :  { %v561_v30 = vpop.xlane.xlu2 %560  ;;  %v789_v35 = vadd.f32 %v788_v9, %v716_v2 }
 0x179   :  { %v629_v20 = vmul.f32 0.0051020407, %v561_v30 }
 0x17a   :  { %790 = vadd.xlane.f32.xlu0 %v789_v35 }
 0x17b   :  { %v2636_v26 = vsub.f32 %v2385_v47, %v629_v20  ;;  %v2639_v29 = vsub.f32 %v2383_v45, %v629_v20 }
 0x17d   :  { %3588 = vst [vmem:[#allocation26_spill] sm:$0xff] %v2636_v26  ;;  %v718_v17 = vmul.f32 %v2636_v26, %v2636_v26  ;;  %v719_v6 = vmul.f32 %v2639_v29, %v2639_v29 }
 0x17e   :  { %3589 = vst [vmem:[#allocation27_spill] sm:$0xff] %v2639_v29 }
 0x17f   :  { %v792_v43 = vsel %vm513_vm1, %v719_v6, 0.0 }
 0x180   :  { %v565_v55 = vpop.xlane.xlu0 %564  ;;  %v793_v44 = vadd.f32 %v792_v43, %v718_v17 }
 0x181   :  { %v630_v34 = vmul.f32 0.0051020407, %v565_v55 }
 0x182   :  { %794 = vadd.xlane.f32.xlu1 %v793_v44 }
 0x183   :  { %v2647_v2 = vsub.f32 %v2394_v62, %v630_v34  ;;  %v2650_v47 = vsub.f32 %v2396_v0, %v630_v34 }
 0x185   :  { %v720_v45 = vmul.f32 %v2647_v2, %v2647_v2  ;;  %v721_v9 = vmul.f32 %v2650_v47, %v2650_v47 }
 0x187   :  { %v796_v30 = vsel %vm513_vm1, %v721_v9, 0.0 }
 0x188   :  { %v569_v35 = vpop.xlane.xlu1 %568  ;;  %v797_v20 = vadd.f32 %v796_v30, %v720_v45 }
 0x189   :  { %v631_v6 = vmul.f32 0.0051020407, %v569_v35 }
 0x18a   :  { %798 = vadd.xlane.f32.xlu2 %v797_v20 }
 0x18b   :  { %v2658_v17 = vsub.f32 %v2409_v23, %v631_v6  ;;  %v2661_v62 = vsub.f32 %v2407_v21, %v631_v6 }
 0x18d   :  { %3590 = vst [vmem:[#allocation28_spill] sm:$0xff] %v2661_v62  ;;  %v722_v0 = vmul.f32 %v2658_v17, %v2658_v17  ;;  %v723_v43 = vmul.f32 %v2661_v62, %v2661_v62 }
 0x18f   :  { %v800_v55 = vsel %vm513_vm1, %v723_v43, 0.0 }
 0x190   :  { %v573_v44 = vpop.xlane.xlu2 %572  ;;  %v801_v34 = vadd.f32 %v800_v55, %v722_v0 }
 0x191   :  { %v632_v9 = vmul.f32 0.0051020407, %v573_v44 }
 0x192   :  { %802 = vadd.xlane.f32.xlu0 %v801_v34 }
 0x193   :  { %v2669_v45 = vsub.f32 %v2416_v39, %v632_v9  ;;  %v2672_v23 = vsub.f32 %v2420_v46, %v632_v9 }
 0x195   :  { %3591 = vst [vmem:[#allocation29_spill] sm:$0xff] %v2669_v45  ;;  %v724_v21 = vmul.f32 %v2669_v45, %v2669_v45  ;;  %v725_v30 = vmul.f32 %v2672_v23, %v2672_v23 }
 0x196   :  { %3592 = vst [vmem:[#allocation30_spill] sm:$0xff] %v2672_v23 }
 0x197   :  { %v804_v35 = vsel %vm513_vm1, %v725_v30, 0.0 }
 0x198   :  { %v577_v20 = vpop.xlane.xlu0 %576  ;;  %v805_v6 = vadd.f32 %v804_v35, %v724_v21 }
 0x199   :  { %v633_v43 = vmul.f32 0.0051020407, %v577_v20 }
 0x19a   :  { %806 = vadd.xlane.f32.xlu1 %v805_v6 }
 0x19b   :  { %v2680_v0 = vsub.f32 %v2431_v12, %v633_v43  ;;  %v2683_v39 = vsub.f32 %v2429_v10, %v633_v43 }
 0x19d   :  { %v726_v46 = vmul.f32 %v2680_v0, %v2680_v0  ;;  %v727_v55 = vmul.f32 %v2683_v39, %v2683_v39  ;;  %v751_v44 = vpop.xlane.xlu2 %750 }
 0x19e   :  { %v852_v21 = vmul.f32 0.0051020407, %v751_v44 }
 0x19f   :  { %v808_v34 = vsel %vm513_vm1, %v727_v55, 0.0 }
 0x1a0   :  { %v581_v9 = vpop.xlane.xlu1 %580  ;;  %v809_v30 = vadd.f32 %v808_v34, %v726_v46  ;;  %v2696_v20 = vadd.f32 1e-05, %v852_v21 }
 0x1a1   :  { %v634_v35 = vmul.f32 0.0051020407, %v581_v9 }
 0x1a2   :  { %810 = vadd.xlane.f32.xlu2 %v809_v30  ;;  %1796 = vrsqrt.f32 %v2696_v20  ;;  %vm936_vm3 = vweird.f32 %v2696_v20 }
 0x1a3   :  { %v2691_v12 = vsub.f32 %v2450_v13, %v634_v35  ;;  %v2694_v10 = vsub.f32 %v2453_v54, %v634_v35 }
 0x1a5   :  { %3593 = vst [vmem:[#allocation31_spill] sm:$0xff] %v2691_v12  ;;  %v755_v6 = vpop.xlane.xlu0 %754  ;;  %v728_v43 = vmul.f32 %v2691_v12, %v2691_v12  ;;  %v729_v55 = vmul.f32 %v2694_v10, %v2694_v10 }
 0x1a6   :  { %3594 = vst [vmem:[#allocation32_spill] sm:$0xff] %v2694_v10  ;;  %v853_v44 = vmul.f32 0.0051020407, %v755_v6 }
 0x1a7   :  { %v812_v46 = vsel %vm513_vm1, %v729_v55, 0.0 }
 0x1a8   :  { %v585_v34 = vpop.xlane.xlu2 %584  ;;  %v813_v9 = vadd.f32 %v812_v46, %v728_v43  ;;  %v2710_v21 = vadd.f32 1e-05, %v853_v44  ;;  %v1797_v55 = vpop.eup %1796 }
 0x1a9   :  { %v635_v13 = vmul.f32 0.0051020407, %v585_v34  ;;  %v931_v44 = vmul.f32 %v1797_v55, %v2696_v20  ;;  %vm937_vm2 = vweird.f32 %v1797_v55 }
 0x1aa   :  { %814 = vadd.xlane.f32.xlu0 %v813_v9  ;;  %1798 = vrsqrt.f32 %v2710_v21  ;;  %vm938_vm4 = vmor %vm936_vm3, %vm937_vm2  ;;  %vm946_vm6 = vweird.f32 %v2710_v21 }
 0x1ab   :  { %v2705_v54 = vsub.f32 %v2473_v19, %v635_v13  ;;  %v2708_v30 = vsub.f32 %v2471_v50, %v635_v13 }
 0x1ad   :  { %3595 = vst [vmem:[#allocation33_spill] sm:$0xff] %v2705_v54  ;;  %v759_v35 = vpop.xlane.xlu1 %758  ;;  %v730_v23 = vmul.f32 %v2705_v54, %v2705_v54  ;;  %v731_v6 = vmul.f32 %v2708_v30, %v2708_v30 }
 0x1ae   :  { %3596 = vst [vmem:[#allocation34_spill] sm:$0xff] %v2708_v30  ;;  %v854_v43 = vmul.f32 0.0051020407, %v759_v35 }
 0x1af   :  { %v816_v46 = vsel %vm513_vm1, %v731_v6, 0.0 }
 0x1b0   :  { %v2718_v19 = vadd.f32 1e-05, %v854_v43  ;;  %v589_v34 = vpop.xlane.xlu0 %588  ;;  %v817_v50 = vadd.f32 %v816_v46, %v730_v23  ;;  %v1799_v23 = vpop.eup %1798  ;;  %v932_v46 = vmul.f32 %v1797_v55, %v931_v44 }
 0x1b1   :  { %v636_v9 = vmul.f32 0.0051020407, %v589_v34  ;;  %vm947_vm5 = vweird.f32 %v1799_v23 }
 0x1b2   :  { %818 = vadd.xlane.f32.xlu1 %v817_v50  ;;  %1800 = vrsqrt.f32 %v2718_v19  ;;  %v933_v12 = vmul.f32 0.5, %v932_v46  ;;  %vm948_vm7 = vmor %vm946_vm6, %vm947_vm5  ;;  %vm956_vm9 = vweird.f32 %v2718_v19 }
 0x1b3   :  { %v2722_v13 = vsub.f32 %v2490_v36, %v636_v9  ;;  %v2725_v54 = vsub.f32 %v2493_v40, %v636_v9  ;;  %v941_v40 = vmul.f32 %v1799_v23, %v2710_v21 }
 0x1b5   :  { %v763_v35 = vpop.xlane.xlu2 %762  ;;  %v732_v6 = vmul.f32 %v2722_v13, %v2722_v13  ;;  %v733_v43 = vmul.f32 %v2725_v54, %v2725_v54  ;;  %v942_v44 = vmul.f32 %v1799_v23, %v941_v40 }
 0x1b6   :  { %v855_v34 = vmul.f32 0.0051020407, %v763_v35 }
 0x1b7   :  { %v820_v50 = vsel %vm513_vm1, %v733_v43, 0.0 }
 0x1b8   :  { %v907_v30 = vadd.f32 1e-05, %v855_v34  ;;  %v593_v36 = vpop.xlane.xlu1 %592  ;;  %v821_v45 = vadd.f32 %v820_v50, %v732_v6  ;;  %v1801_v10 = vpop.eup %1800  ;;  %v934_v34 = vsub.f32 1.5, %v933_v12  ;;  %v878_v12 = vld [vmem:[%s3516_s2] sm:$0xff] }
 0x1b9   :  { %v637_v9 = vmul.f32 0.0051020407, %v593_v36  ;;  %v951_v35 = vmul.f32 %v1801_v10, %v2718_v19  ;;  %v943_v36 = vmul.f32 0.5, %v942_v44  ;;  %vm957_vm8 = vweird.f32 %v1801_v10 }
 0x1ba   :  { %1802 = vrsqrt.f32 %v907_v30  ;;  %822 = vadd.xlane.f32.xlu2 %v821_v45  ;;  %vm958_vm10 = vmor %vm956_vm9, %vm957_vm8  ;;  %vm966_vm12 = vweird.f32 %v907_v30 }
 0x1bb   :  { %v2735_v29 = vsub.f32 %v2511_v5, %v637_v9  ;;  %v2738_v26 = vsub.f32 %v2509_v60, %v637_v9  ;;  %v952_v5 = vmul.f32 %v1801_v10, %v951_v35  ;;  %v935_v60 = vmul.f32 %v1797_v55, %v934_v34 }
 0x1bc   :  { %v944_v40 = vsub.f32 1.5, %v943_v36 }
 0x1bd   :  { %3597 = vst [vmem:[#allocation35_spill] sm:$0xff] %v2735_v29  ;;  %v734_v43 = vmul.f32 %v2735_v29, %v2735_v29  ;;  %v735_v6 = vmul.f32 %v2738_v26, %v2738_v26  ;;  %v953_v9 = vmul.f32 0.5, %v952_v5 }
 0x1be   :  { %3598 = vst [vmem:[#allocation36_spill] sm:$0xff] %v2738_v26  ;;  %v939_v26 = vsel %vm938_vm4, %v1797_v55, %v935_v60  ;;  %v945_v35 = vmul.f32 %v1799_v23, %v944_v40 }
 0x1bf   :  { %v824_v46 = vsel %vm513_vm1, %v735_v6, 0.0  ;;  %v954_v6 = vsub.f32 1.5, %v953_v9  ;;  %v1190_v44 = vmul.f32 %v939_v26, %v878_v12  ;;  %v880_v26 = vld [vmem:[%s3516_s2 + $0x10] sm:$0xff]  ;;  %v767_v9 = vpop.xlane.xlu0 %766 }
 0x1c0   :  { %v1803_v50 = vpop.eup %1802  ;;  %v825_v45 = vadd.f32 %v824_v46, %v734_v43  ;;  %v949_v34 = vsel %vm948_vm7, %v1799_v23, %v945_v35  ;;  %v881_v23 = vld [vmem:[%s3516_s2 + $0x18] sm:$0xff]  ;;  %v597_v19 = vpop.xlane.xlu2 %596  ;;  %v856_v12 = vmul.f32 0.0051020407, %v767_v9 }
 0x1c1   :  { %v961_v62 = vmul.f32 %v1803_v50, %v907_v30  ;;  %v955_v46 = vmul.f32 %v1801_v10, %v954_v6  ;;  %vm967_vm11 = vweird.f32 %v1803_v50 }
 0x1c2   :  { %826 = vadd.xlane.f32.xlu0 %v825_v45  ;;  %vm968_vm13 = vmor %vm966_vm12, %vm967_vm11  ;;  %v908_v30 = vadd.f32 1e-05, %v856_v12 }
 0x1c3   :  { %v962_v29 = vmul.f32 %v1803_v50, %v961_v62  ;;  %v879_v62 = vld [vmem:[%s3516_s2 + $0x8] sm:$0xff] }
 0x1c4   :  { %v1191_v55 = vmul.f32 %v949_v34, %v879_v62  ;;  %1804 = vrsqrt.f32 %v908_v30  ;;  %vm976_vm15 = vweird.f32 %v908_v30 }
 0x1c5   :  { %v963_v43 = vmul.f32 0.5, %v962_v29  ;;  %v959_v29 = vsel %vm958_vm10, %v1801_v10, %v955_v46  ;;  %v771_v60 = vpop.xlane.xlu1 %770  ;;  %v638_v10 = vmul.f32 0.0051020407, %v597_v19 }
 0x1c6   :  { %v1192_v45 = vmul.f32 %v959_v29, %v880_v26  ;;  %v857_v29 = vmul.f32 0.0051020407, %v771_v60 }
 0x1c7   :  { %v964_v20 = vsub.f32 1.5, %v963_v43  ;;  %v2769_v35 = vsub.f32 %v2526_v58, %v638_v10 }
 0x1c8   :  { %v601_v62 = vpop.xlane.xlu0 %600 }
 0x1c9   :  { %v965_v21 = vmul.f32 %v1803_v50, %v964_v20  ;;  %3600 = vst [vmem:[#allocation38_spill] sm:$0xff] %v2769_v35 }
 0x1cb   :  { %1270 = vperm.xlu1 %1793, %v1190_v44   ;;  %v969_v36 = vsel %vm968_vm13, %v1803_v50, %v965_v21  ;;  %v2766_v44 = vsub.f32 %v2529_v8, %v638_v10  ;;  %v1805_v8 = vpop.eup %1804  ;;  %v639_v21 = vmul.f32 0.0051020407, %v601_v62 }
 0x1cc   :  { %v1193_v5 = vmul.f32 %v969_v36, %v881_v23  ;;  %v971_v19 = vmul.f32 %v1805_v8, %v908_v30  ;;  %vm977_vm14 = vweird.f32 %v1805_v8 }
 0x1cd   :  { %v2761_v40 = vpop.xlane.xlu2 %774  ;;  %3599 = vst [vmem:[#allocation37_spill] sm:$0xff] %v2766_v44  ;;  %v737_v20 = vmul.f32 %v2766_v44, %v2766_v44  ;;  %v2782_v9 = vsub.f32 %v2547_v18, %v639_v21  ;;  %vm978_vm0 = vmor %vm976_vm15, %vm977_vm14 }
 0x1cf   :  { %v828_v26 = vsel %vm513_vm1, %v737_v20, 0.0  ;;  %3601 = vst [vmem:[#allocation39_spill] sm:$0xff] %v2782_v9  ;;  %v972_v20 = vmul.f32 %v1805_v8, %v971_v19  ;;  %v739_v18 = vmul.f32 %v2782_v9, %v2782_v9 }
 0x1d0   :  { %v605_v6 = vpop.xlane.xlu1 %604 }
 0x1d1   :  { %v640_v34 = vmul.f32 0.0051020407, %v605_v6 }
 0x1d2   :  { %1275 = vperm.xlu2 %1795, %v1191_v55   ;;  %v736_v55 = vmul.f32 %v2769_v35, %v2769_v35 }
 0x1d3   :  { %v2779_v58 = vsub.f32 %v2565_v41, %v640_v34  ;;  %v2785_v12 = vsub.f32 %v2562_v28, %v640_v34  ;;  %v2790_v41 = vsub.f32 %v2544_v38, %v639_v21 }
 0x1d4   :  { %v829_v23 = vadd.f32 %v828_v26, %v736_v55 }
 0x1d5   :  { %v741_v60 = vmul.f32 %v2779_v58, %v2779_v58  ;;  %3602 = vst [vmem:[#allocation40_spill] sm:$0xff] %v2790_v41  ;;  %v740_v62 = vmul.f32 %v2785_v12, %v2785_v12  ;;  %v738_v26 = vmul.f32 %v2790_v41, %v2790_v41 }
 0x1d6   :  { %1280 = vperm.xlu0 %1794, %v1192_v45  }
 0x1d7   :  { %v836_v34 = vsel %vm513_vm1, %v741_v60, 0.0 }
 0x1d8   :  { %v2763_v43 = vpop.xlane.xlu2 %608  ;;  %v837_v21 = vadd.f32 %v836_v34, %v740_v62 }
 0x1da   :  { %1285 = vperm.xlu2 %1795, %v1193_v5   ;;  %v909_v5 = vadd.f32 1e-05, %v857_v29 }
 0x1dc   :  { %1806 = vrsqrt.f32 %v909_v5  ;;  %vm986_vm4 = vweird.f32 %v909_v5 }
 0x1dd   :  { %v2771_v50 = vpop.xlane.xlu1 %782 }
 0x1e5   :  { %v787_v46 = vpop.xlane.xlu2 %786 }
 0x1e6   :  { %v861_v45 = vmul.f32 0.0051020407, %v787_v46  ;;  %v973_v46 = vmul.f32 0.5, %v972_v20 }
 0x1e8   :  { %v617_v36 = vpop.xlane.xlu1 %616  ;;  %v913_v10 = vadd.f32 1e-05, %v861_v45  ;;  %v832_v45 = vsel %vm513_vm1, %v739_v18, 0.0  ;;  %v974_v60 = vsub.f32 1.5, %v973_v46  ;;  %v882_v46 = vld [vmem:[%s3516_s2 + $0x20] sm:$0xff] }
 0x1e9   :  { %v643_v6 = vmul.f32 0.0051020407, %v617_v36  ;;  %v833_v20 = vadd.f32 %v832_v45, %v738_v26 }
 0x1ea   :  { %1808 = vrsqrt.f32 %v913_v10  ;;  %v975_v62 = vmul.f32 %v1805_v8, %v974_v60  ;;  %vm1026_vm6 = vweird.f32 %v913_v10 }
 0x1eb   :  { %v2797_v28 = vsub.f32 %v2619_v61, %v643_v6  ;;  %v2803_v38 = vsub.f32 %v2616_v52, %v643_v6 }
 0x1ec   :  { %v979_v26 = vsel %vm978_vm0, %v1805_v8, %v975_v62  ;;  %v883_v8 = vld [vmem:[%s3516_s2 + $0x28] sm:$0xff] }
 0x1ed   :  { %3603 = vst [vmem:[#allocation41_spill] sm:$0xff] %v2797_v28  ;;  %v747_v36 = vmul.f32 %v2797_v28, %v2797_v28  ;;  %v746_v41 = vmul.f32 %v2803_v38, %v2803_v38 }
 0x1ee   :  { %3604 = vst [vmem:[#allocation42_spill] sm:$0xff] %v2803_v38 }
 0x1ef   :  { %v848_v6 = vsel %vm513_vm1, %v747_v36, 0.0 }
 0x1f0   :  { %v849_v34 = vadd.f32 %v848_v6, %v746_v41 }
 0x1f5   :  { %830 = vadd.xlane.f32.xlu1 %v829_v23  ;;  %v1807_v23 = vpop.eup %1806 }
 0x1f6   :  { %v1809_v61 = vpop.eup %1808  ;;  %v981_v9 = vmul.f32 %v1807_v23, %v909_v5  ;;  %vm987_vm2 = vweird.f32 %v1807_v23 }
 0x1f7   :  { %v1021_v52 = vmul.f32 %v1809_v61, %v913_v10  ;;  %vm1027_vm3 = vweird.f32 %v1809_v61  ;;  %vm988_vm5 = vmor %vm986_vm4, %vm987_vm2 }
 0x1f8   :  { %v982_v18 = vmul.f32 %v1807_v23, %v981_v9  ;;  %vm1028_vm7 = vmor %vm1026_vm6, %vm1027_vm3 }
 0x1fd   :  { %v799_v55 = vpop.xlane.xlu2 %798 }
 0x1fe   :  { %v864_v29 = vmul.f32 0.0051020407, %v799_v55  ;;  %v1022_v55 = vmul.f32 %v1809_v61, %v1021_v52 }
 0x200   :  { %v916_v19 = vadd.f32 1e-05, %v864_v29  ;;  %838 = vadd.xlane.f32.xlu0 %v837_v21  ;;  %v983_v29 = vmul.f32 0.5, %v982_v18  ;;  %v1023_v21 = vmul.f32 0.5, %v1022_v55  ;;  %v779_v55 = vpop.xlane.xlu0 %778 }
 0x202   :  { %1810 = vrsqrt.f32 %v916_v19  ;;  %v984_v38 = vsub.f32 1.5, %v983_v29  ;;  %v1024_v36 = vsub.f32 1.5, %v1023_v21  ;;  %vm1056_vm9 = vweird.f32 %v916_v19 }
 0x203   :  { %834 = vadd.xlane.f32.xlu2 %v833_v20  ;;  %v1194_v20 = vmul.f32 %v979_v26, %v882_v46 }
 0x204   :  { %v985_v9 = vmul.f32 %v1807_v23, %v984_v38  ;;  %v1025_v41 = vmul.f32 %v1809_v61, %v1024_v36  ;;  %v858_v36 = vmul.f32 0.0051020407, %v2761_v40  ;;  %v859_v40 = vmul.f32 0.0051020407, %v779_v55 }
 0x206   :  { %v989_v62 = vsel %vm988_vm5, %v1807_v23, %v985_v9  ;;  %v1029_v38 = vsel %vm1028_vm7, %v1809_v61, %v1025_v41  ;;  %v890_v23 = vld [vmem:[%s3516_s2 + $0x60] sm:$0xff]  ;;  %v795_v9 = vpop.xlane.xlu1 %794  ;;  %v2824_v41 = vadd.f32 1e-05, %v858_v36 }
 0x207   :  { %v1195_v26 = vmul.f32 %v989_v62, %v883_v8 }
 0x208   :  { %v1811_v28 = vpop.eup %1810  ;;  %850 = vadd.xlane.f32.xlu0 %v849_v34  ;;  %v887_v34 = vld [vmem:[%s3516_s2 + $0x48] sm:$0xff]  ;;  %vm996_vm3 = vweird.f32 %v2824_v41 }
 0x209   :  { %v1051_v45 = vmul.f32 %v1811_v28, %v916_v19  ;;  %v1199_v5 = vmul.f32 %v1029_v38, %v887_v34  ;;  %vm1057_vm8 = vweird.f32 %v1811_v28  ;;  %v641_v19 = vmul.f32 0.0051020407, %v2763_v43 }
 0x20a   :  { %vm1058_vm10 = vmor %vm1056_vm9, %vm1057_vm8  ;;  %v860_v34 = vmul.f32 0.0051020407, %v2771_v50 }
 0x20b   :  { %v1052_v60 = vmul.f32 %v1811_v28, %v1051_v45  ;;  %v613_v45 = vpop.xlane.xlu0 %612  ;;  %v2832_v62 = vsub.f32 %v2583_v27, %v641_v19 }
 0x20d   :  { %v1053_v30 = vmul.f32 0.5, %v1052_v60  ;;  %3605 = vst [vmem:[#allocation43_spill] sm:$0xff] %v2832_v62  ;;  %v743_v55 = vmul.f32 %v2832_v62, %v2832_v62 }
 0x20e   :  { %1290 = vperm.xlu1 %1793, %v1194_v20   ;;  %v2835_v38 = vpop.xlane.xlu1 %806 }
 0x20f   :  { %v1054_v18 = vsub.f32 1.5, %v1053_v30 }
 0x211   :  { %v1055_v10 = vmul.f32 %v1811_v28, %v1054_v18 }
 0x213   :  { %v1059_v29 = vsel %vm1058_vm10, %v1811_v28, %v1055_v10  ;;  %v893_v28 = vld [vmem:[%s3516_s2 + $0x78] sm:$0xff]  ;;  %v2840_v10 = vadd.f32 1e-05, %v859_v40  ;;  %v863_v40 = vmul.f32 0.0051020407, %v795_v9 }
 0x214   :  { %v1202_v61 = vmul.f32 %v1059_v29, %v890_v23  ;;  %v2844_v23 = vadd.f32 1e-05, %v860_v34 }
 0x215   :  { %v811_v52 = vpop.xlane.xlu2 %810  ;;  %vm1006_vm9 = vweird.f32 %v2840_v10 }
 0x216   :  { %v867_v6 = vmul.f32 0.0051020407, %v811_v52  ;;  %vm1016_vm6 = vweird.f32 %v2844_v23 }
 0x218   :  { %v919_v46 = vadd.f32 1e-05, %v867_v6  ;;  %v791_v6 = vpop.xlane.xlu0 %790 }
 0x219   :  { %v862_v34 = vmul.f32 0.0051020407, %v791_v6 }
 0x21a   :  { %1812 = vrsqrt.f32 %v919_v46  ;;  %vm1086_vm12 = vweird.f32 %v919_v46 }
 0x21b   :  { %1295 = vperm.xlu2 %1795, %v1195_v26   ;;  %1814 = vrsqrt.f32 %v2824_v41 }
 0x21c   :  { %1315 = vperm.xlu0 %1794, %v1199_v5  }
 0x220   :  { %v1813_v21 = vpop.eup %1812  ;;  %v2846_v27 = vpop.xlane.xlu0 %802 }
 0x221   :  { %v1081_v20 = vmul.f32 %v1813_v21, %v919_v46  ;;  %vm1087_vm11 = vweird.f32 %v1813_v21  ;;  %v2838_v46 = vsub.f32 %v2580_v7, %v641_v19  ;;  %v2850_v50 = vpop.eup %1814 }
 0x222   :  { %vm1088_vm13 = vmor %vm1086_vm12, %vm1087_vm11  ;;  %vm997_vm2 = vweird.f32 %v2850_v50 }
 0x223   :  { %v1082_v60 = vmul.f32 %v1813_v21, %v1081_v20  ;;  %3606 = vst [vmem:[#allocation44_spill] sm:$0xff] %v2838_v46  ;;  %v742_v7 = vmul.f32 %v2838_v46, %v2838_v46  ;;  %v840_v20 = vsel %vm513_vm1, %v743_v55, 0.0  ;;  %vm2987_vm4 = vmor %vm996_vm3, %vm997_vm2 }
 0x224   :  { %1330 = vperm.xlu0 %1794, %v1202_v61   ;;  %v991_v61 = vmul.f32 %v2850_v50, %v2824_v41  ;;  %v884_v41 = vld [vmem:[%s3516_s2 + $0x30] sm:$0xff] }
 0x225   :  { %v1083_v30 = vmul.f32 0.5, %v1082_v60  ;;  %v2863_v60 = vpop.xlane.xlu1 %818 }
 0x227   :  { %v1084_v52 = vsub.f32 1.5, %v1083_v30  ;;  %v1219_v30 = vld [vmem:[%s3517_s4 + $0x18] sm:$0xff] }
 0x229   :  { %v1085_v8 = vmul.f32 %v1813_v21, %v1084_v52 }
 0x22b   :  { %v1089_v18 = vsel %vm1088_vm13, %v1813_v21, %v1085_v8  ;;  %v642_v21 = vmul.f32 0.0051020407, %v613_v45  ;;  %v1218_v45 = vld [vmem:[%s3517_s4 + $0x10] sm:$0xff]  ;;  %v841_v8 = vadd.f32 %v840_v20, %v742_v7  ;;  %v2891_v20 = vadd.f32 1e-05, %v863_v40  ;;  %v1217_v40 = vld [vmem:[%s3517_s4 + $0x8] sm:$0xff] }
 0x22c   :  { %v1205_v43 = vmul.f32 %v1089_v18, %v893_v28 }
 0x22d   :  { %v823_v26 = vpop.xlane.xlu2 %822  ;;  %v2861_v36 = vsub.f32 %v2601_v3, %v642_v21  ;;  %v992_v3 = vmul.f32 %v2850_v50, %v991_v61  ;;  %v2881_v62 = vsub.f32 %v2598_v22, %v642_v21  ;;  %v2898_v21 = vadd.f32 1e-05, %v862_v34 }
 0x22e   :  { %v870_v5 = vmul.f32 0.0051020407, %v823_v26  ;;  %1345 = vperm.xlu0 %1794, %v1205_v43   ;;  %v2876_v43 = vpop.xlane.xlu0 %814  ;;  %vm1046_vm12 = vweird.f32 %v2891_v20 }
 0x22f   :  { %3607 = vst [vmem:[#allocation45_spill] sm:$0xff] %v2861_v36  ;;  %v744_v34 = vmul.f32 %v2881_v62, %v2881_v62 }
 0x230   :  { %v2848_v29 = vadd.f32 1e-05, %v870_v5  ;;  %3608 = vst [vmem:[#allocation46_spill] sm:$0xff] %v2881_v62 }
 0x232   :  { %1816 = vrsqrt.f32 %v2848_v29  ;;  %vm1116_vm15 = vweird.f32 %v2848_v29 }
 0x233   :  { %1818 = vrsqrt.f32 %v2840_v10 }
 0x234   :  { %1820 = vrsqrt.f32 %v2844_v23 }
 0x235   :  { %v1276_v19 = vpop.permute.xlu2 %1275  ;;  %1822 = vrsqrt.f32 %v2891_v20 }
 0x236   :  { %v1400_v52 = vmul.f32 %v1276_v19, %v2458_v14  ;;  %v1401_v28 = vmul.f32 %v1276_v19, %v2461_v53  ;;  %v745_v53 = vmul.f32 %v2861_v36, %v2861_v36  ;;  %v2931_v46 = vpop.xlane.xlu0 %826  ;;  %1824 = vrsqrt.f32 %v2898_v21 }
 0x238   :  { %v2873_v18 = vpop.eup %1816  ;;  %v1452_v26 = vadd.f32 %v1400_v52, %v1218_v45  ;;  %v1453_v5 = vadd.f32 %v1401_v28, %v1219_v30  ;;  %842 = vadd.xlane.f32.xlu1 %v841_v8  ;;  %v2894_v45 = vmul.f32 0.5, %v992_v3  ;;  %v1222_v30 = vld [vmem:[%s3517_s4 + $0x30] sm:$0xff]  ;;  %v1223_v52 = vld [vmem:[%s3517_s4 + $0x38] sm:$0xff]  ;;  %v1216_v8 = vld [vmem:[%s3517_s4] sm:$0xff] }
 0x239   :  { %v2878_v55 = vpop.eup %1818  ;;  %v1111_v14 = vmul.f32 %v2873_v18, %v2848_v29  ;;  %vm1117_vm14 = vweird.f32 %v2873_v18 }
 0x23a   :  { %v2887_v9 = vpop.eup %1820  ;;  %v1660_v6 = vadd.f32 %v2311_v32, %v1452_v26  ;;  %v1661_v7 = vadd.f32 %v2311_v32, %v1453_v5  ;;  %v1001_v22 = vmul.f32 %v2878_v55, %v2840_v10  ;;  %v844_v26 = vsel %vm513_vm1, %v745_v53, 0.0  ;;  %vm1118_vm0 = vmor %vm1116_vm15, %vm1117_vm14 }
 0x23b   :  { %v1112_v61 = vmul.f32 %v2873_v18, %v1111_v14  ;;  %v1011_v32 = vmul.f32 %v2887_v9, %v2844_v23  ;;  %vm1017_vm5 = vweird.f32 %v2887_v9  ;;  %vm1007_vm7 = vweird.f32 %v2878_v55  ;;  %v886_v23 = vld [vmem:[%s3516_s2 + $0x40] sm:$0xff] }
 0x23c   :  { %1712 = vst [vmem:[%s3518_s5 + $0x10] sm:$0xff] %v1660_v6  ;;  %vm1018_vm8 = vmor %vm1016_vm6, %vm1017_vm5  ;;  %vm1036_vm15 = vweird.f32 %v2898_v21 }
 0x23d   :  { %v1113_v19 = vmul.f32 0.5, %v1112_v61  ;;  %1713 = vst.msk [vmem:[%s3518_s5 + $0x18] sm:$0xff] %vm513_vm1, %v1661_v7  ;;  %v1286_v28 = vpop.permute.xlu2 %1285  ;;  %v1271_v3 = vpop.permute.xlu1 %1270  ;;  %v866_v61 = vmul.f32 0.0051020407, %v2835_v38  ;;  %vm1008_vm10 = vmor %vm1006_vm9, %vm1007_vm7 }
 0x23e   :  { %v1404_v5 = vmul.f32 %v1286_v28, %v2498_v1  ;;  %v1405_v14 = vmul.f32 %v1286_v28, %v2501_v51  ;;  %v1398_v6 = vmul.f32 %v1271_v3, %v2438_v57  ;;  %v1399_v7 = vmul.f32 %v1271_v3, %v2441_v63  ;;  %v896_v57 = vld [vmem:[%s3516_s2 + $0x90] sm:$0xff] }
 0x23f   :  { %v1114_v36 = vsub.f32 1.5, %v1113_v19  ;;  %v845_v1 = vadd.f32 %v844_v26, %v744_v34  ;;  %v865_v51 = vmul.f32 0.0051020407, %v2846_v27  ;;  %v2952_v27 = vpop.eup %1822 }
 0x240   :  { %v1456_v62 = vadd.f32 %v1404_v5, %v1222_v30  ;;  %v1457_v44 = vadd.f32 %v1405_v14, %v1223_v52  ;;  %v1450_v53 = vadd.f32 %v1398_v6, %v1216_v8  ;;  %v1451_v35 = vadd.f32 %v1399_v7, %v1217_v40 }
 0x241   :  { %v1115_v63 = vmul.f32 %v2873_v18, %v1114_v36  ;;  %v2943_v52 = vadd.f32 1e-05, %v866_v61  ;;  %v994_v8 = vsub.f32 1.5, %v2894_v45  ;;  %v1012_v40 = vmul.f32 %v2887_v9, %v1011_v32  ;;  %v1220_v45 = vld [vmem:[%s3517_s4 + $0x20] sm:$0xff] }
 0x242   :  { %v1664_v38 = vadd.f32 %v2356_v11, %v1456_v62  ;;  %v1665_v30 = vadd.f32 %v2356_v11, %v1457_v44  ;;  %v1658_v19 = vadd.f32 %v2341_v59, %v1450_v53  ;;  %v1659_v29 = vadd.f32 %v2341_v59, %v1451_v35  ;;  %v2964_v44 = vpop.eup %1824 }
 0x243   :  { %v1119_v28 = vsel %vm1118_vm0, %v2873_v18, %v1115_v63  ;;  %v1002_v59 = vmul.f32 %v2878_v55, %v1001_v22  ;;  %v2959_v11 = vadd.f32 1e-05, %v865_v51  ;;  %1826 = vrsqrt.f32 %v2943_v52  ;;  %v1221_v22 = vld [vmem:[%s3517_s4 + $0x28] sm:$0xff] }
 0x244   :  { %1716 = vst [vmem:[%s3518_s5 + $0x30] sm:$0xff] %v1664_v38  ;;  %846 = vadd.xlane.f32.xlu2 %v845_v1  ;;  %v1208_v62 = vmul.f32 %v1119_v28, %v896_v57  ;;  %v869_v35 = vmul.f32 0.0051020407, %v2863_v60  ;;  %v1013_v36 = vmul.f32 0.5, %v1012_v40  ;;  %v1041_v18 = vmul.f32 %v2952_v27, %v2891_v20  ;;  %v889_v20 = vld [vmem:[%s3516_s2 + $0x58] sm:$0xff] }
 0x245   :  { %1717 = vst.msk [vmem:[%s3518_s5 + $0x38] sm:$0xff] %vm513_vm1, %v1665_v30  ;;  %v995_v32 = vmul.f32 %v2850_v50, %v994_v8  ;;  %v1003_v26 = vmul.f32 0.5, %v1002_v59  ;;  %1828 = vrsqrt.f32 %v2959_v11  ;;  %v868_v5 = vmul.f32 0.0051020407, %v2876_v43 }
 0x246   :  { %1710 = vst [vmem:[%s3518_s5] sm:$0xff] %v1658_v19  ;;  %1360 = vperm.xlu0 %1794, %v1208_v62   ;;  %v1031_v6 = vmul.f32 %v2964_v44, %v2898_v21  ;;  %v2993_v7 = vadd.f32 1e-05, %v869_v35  ;;  %v1014_v53 = vsub.f32 1.5, %v1013_v36  ;;  %v871_v8 = vmul.f32 0.0051020407, %v2931_v46 }
 0x247   :  { %1711 = vst.msk [vmem:[%s3518_s5 + $0x8] sm:$0xff] %vm513_vm1, %v1659_v29  ;;  %v999_v43 = vsel %vm2987_vm4, %v2850_v50, %v995_v32  ;;  %v3006_v51 = vadd.f32 1e-05, %v868_v5  ;;  %v1004_v38 = vsub.f32 1.5, %v1003_v26  ;;  %vm1047_vm11 = vweird.f32 %v2952_v27 }
 0x248   :  { %v1281_v60 = vpop.permute.xlu0 %1280  ;;  %v1032_v30 = vmul.f32 %v2964_v44, %v1031_v6  ;;  %1830 = vrsqrt.f32 %v2993_v7  ;;  %v1196_v19 = vmul.f32 %v999_v43, %v884_v41  ;;  %v1015_v28 = vmul.f32 %v2887_v9, %v1014_v53  ;;  %vm1048_vm14 = vmor %vm1046_vm12, %vm1047_vm11 }
 0x249   :  { %v1402_v3 = vmul.f32 %v1281_v60, %v2478_v15  ;;  %v1403_v34 = vmul.f32 %v1281_v60, %v2481_v24  ;;  %v1042_v24 = vmul.f32 %v2952_v27, %v1041_v18  ;;  %v3002_v1 = vpop.eup %1826  ;;  %1832 = vrsqrt.f32 %v3006_v51 }
 0x24a   :  { %v1033_v40 = vmul.f32 0.5, %v1032_v30  ;;  %v1005_v59 = vmul.f32 %v2878_v55, %v1004_v38  ;;  %v1019_v18 = vsel %vm1018_vm8, %v2887_v9, %v1015_v28  ;;  %v3038_v46 = vadd.f32 1e-05, %v871_v8  ;;  %v892_v8 = vld [vmem:[%s3516_s2 + $0x70] sm:$0xff] }
 0x24b   :  { %v1454_v61 = vadd.f32 %v1402_v3, %v1220_v45  ;;  %v1455_v15 = vadd.f32 %v1403_v34, %v1221_v22  ;;  %v3013_v29 = vpop.eup %1828  ;;  %v1043_v50 = vmul.f32 0.5, %v1042_v24  ;;  %v1198_v32 = vmul.f32 %v1019_v18, %v886_v23  ;;  %v885_v3 = vld [vmem:[%s3516_s2 + $0x38] sm:$0xff] }
 0x24c   :  { %v1061_v62 = vmul.f32 %v3013_v29, %v2959_v11  ;;  %v1034_v22 = vsub.f32 1.5, %v1033_v40  ;;  %v1009_v34 = vsel %vm1008_vm10, %v2878_v55, %v1005_v59  ;;  %1834 = vrsqrt.f32 %v3038_v46 }
 0x24d   :  { %v1662_v57 = vadd.f32 %v2378_v37, %v1454_v61  ;;  %v1663_v63 = vadd.f32 %v2378_v37, %v1455_v15  ;;  %v1071_v37 = vmul.f32 %v3002_v1, %v2943_v52  ;;  %v1044_v35 = vsub.f32 1.5, %v1043_v50 }
 0x24e   :  { %v3035_v45 = vpop.eup %1830  ;;  %v1062_v60 = vmul.f32 %v3013_v29, %v1061_v62  ;;  %v1197_v14 = vmul.f32 %v1009_v34, %v885_v3  ;;  %vm1037_vm13 = vweird.f32 %v2964_v44  ;;  %v1035_v61 = vmul.f32 %v2964_v44, %v1034_v22 }
 0x24f   :  { %1714 = vst [vmem:[%s3518_s5 + $0x20] sm:$0xff] %v1662_v57  ;;  %v1072_v36 = vmul.f32 %v3002_v1, %v1071_v37  ;;  %v3045_v26 = vpop.eup %1832  ;;  %v1101_v10 = vmul.f32 %v3035_v45, %v2993_v7  ;;  %v1045_v5 = vmul.f32 %v2952_v27, %v1044_v35  ;;  %vm1038_vm0 = vmor %vm1036_vm15, %vm1037_vm13  ;;  %vm1077_vm2 = vweird.f32 %v3002_v1  ;;  %v891_v35 = vld [vmem:[%s3516_s2 + $0x68] sm:$0xff] }
 0x250   :  { %1715 = vst.msk [vmem:[%s3518_s5 + $0x28] sm:$0xff] %vm513_vm1, %v1663_v63  ;;  %v1063_v55 = vmul.f32 0.5, %v1062_v60  ;;  %v1091_v6 = vmul.f32 %v3045_v26, %v3006_v51  ;;  %v888_v63 = vld [vmem:[%s3516_s2 + $0x50] sm:$0xff]  ;;  %v1039_v38 = vsel %vm1038_vm0, %v2964_v44, %v1035_v61  ;;  %vm1076_vm3 = vweird.f32 %v2943_v52 }
 0x251   :  { %1300 = vperm.xlu1 %1793, %v1196_v19   ;;  %v1073_v9 = vmul.f32 0.5, %v1072_v36  ;;  %v1102_v53 = vmul.f32 %v3035_v45, %v1101_v10  ;;  %v1049_v24 = vsel %vm1048_vm14, %v2952_v27, %v1045_v5  ;;  %v1200_v21 = vmul.f32 %v1039_v38, %v888_v63  ;;  %vm1078_vm5 = vmor %vm1076_vm3, %vm1077_vm2 }
 0x252   :  { %v1064_v41 = vsub.f32 1.5, %v1063_v55  ;;  %v1092_v43 = vmul.f32 %v3045_v26, %v1091_v6  ;;  %v1201_v57 = vmul.f32 %v1049_v24, %v889_v20  ;;  %v3068_v30 = vpop.eup %1834  ;;  %vm1067_vm4 = vweird.f32 %v3013_v29 }
 0x253   :  { %v1074_v15 = vsub.f32 1.5, %v1073_v9  ;;  %v1103_v19 = vmul.f32 0.5, %v1102_v53  ;;  %v1121_v37 = vmul.f32 %v3068_v30, %v3038_v46  ;;  %vm1066_vm6 = vweird.f32 %v2959_v11  ;;  %v894_v9 = vld [vmem:[%s3516_s2 + $0x80] sm:$0xff] }
 0x254   :  { %v1093_v50 = vmul.f32 0.5, %v1092_v43  ;;  %v1065_v44 = vmul.f32 %v3013_v29, %v1064_v41  ;;  %vm1068_vm7 = vmor %vm1066_vm6, %vm1067_vm4  ;;  %vm1107_vm8 = vweird.f32 %v3035_v45  ;;  %vm1106_vm9 = vweird.f32 %v2993_v7 }
 0x255   :  { %v1075_v27 = vmul.f32 %v3002_v1, %v1074_v15  ;;  %v1104_v28 = vsub.f32 1.5, %v1103_v19  ;;  %v1122_v62 = vmul.f32 %v3068_v30, %v1121_v37  ;;  %vm1097_vm10 = vweird.f32 %v3045_v26  ;;  %vm1108_vm11 = vmor %vm1106_vm9, %vm1107_vm8  ;;  %v1227_v37 = vld [vmem:[%s3517_s4 + $0x58] sm:$0xff] }
 0x256   :  { %v1094_v52 = vsub.f32 1.5, %v1093_v50  ;;  %v1069_v36 = vsel %vm1068_vm7, %v3013_v29, %v1065_v44  ;;  %v895_v29 = vld [vmem:[%s3516_s2 + $0x88] sm:$0xff]  ;;  %vm1096_vm12 = vweird.f32 %v3006_v51  ;;  %vm1127_vm14 = vweird.f32 %v3068_v30  ;;  %v1226_v50 = vld [vmem:[%s3517_s4 + $0x50] sm:$0xff] }
 0x257   :  { %v1079_v40 = vsel %vm1078_vm5, %v3002_v1, %v1075_v27  ;;  %v1105_v18 = vmul.f32 %v3035_v45, %v1104_v28  ;;  %v1203_v11 = vmul.f32 %v1069_v36, %v891_v35  ;;  %v1123_v1 = vmul.f32 0.5, %v1122_v62  ;;  %vm1098_vm13 = vmor %vm1096_vm12, %vm1097_vm10  ;;  %v898_v27 = vld [vmem:[%s3516_s2 + $0xa0] sm:$0xff] }
 0x258   :  { %v1204_v59 = vmul.f32 %v1079_v40, %v892_v8  ;;  %vm1126_vm15 = vweird.f32 %v3038_v46  ;;  %v1224_v62 = vld [vmem:[%s3517_s4 + $0x40] sm:$0xff] }
 0x259   :  { %1310 = vperm.xlu1 %1793, %v1198_v32   ;;  %v1095_v32 = vmul.f32 %v3045_v26, %v1094_v52  ;;  %v1109_v3 = vsel %vm1108_vm11, %v3035_v45, %v1105_v18  ;;  %v1124_v7 = vsub.f32 1.5, %v1123_v1  ;;  %vm1128_vm0 = vmor %vm1126_vm15, %vm1127_vm14 }
 0x25a   :  { %v1207_v34 = vmul.f32 %v1109_v3, %v895_v29 }
 0x25b   :  { %v1099_v10 = vsel %vm1098_vm13, %v3045_v26, %v1095_v32  ;;  %v1125_v45 = vmul.f32 %v3068_v30, %v1124_v7  ;;  %v897_v26 = vld [vmem:[%s3516_s2 + $0x98] sm:$0xff] }
 0x25c   :  { %1305 = vperm.xlu2 %1795, %v1197_v14   ;;  %v1206_v5 = vmul.f32 %v1099_v10, %v894_v9  ;;  %v3611_v32 = vld [vmem:[#allocation9_spill] sm:$0xff] }
 0x25d   :  { %v1129_v24 = vsel %vm1128_vm0, %v3068_v30, %v1125_v45 }
 0x25e   :  { %v1209_v63 = vmul.f32 %v1129_v24, %v897_v26  ;;  %v899_v26 = vld [vmem:[%s3516_s2 + $0xa8] sm:$0xff] }
 0x261   :  { %1325 = vperm.xlu1 %1793, %v1201_v57  }
 0x264   :  { %1320 = vperm.xlu2 %1795, %v1200_v21  }
 0x268   :  { %v831_v23 = vpop.xlane.xlu1 %830 }
 0x269   :  { %v872_v22 = vmul.f32 0.0051020407, %v831_v23  ;;  %1340 = vperm.xlu1 %1793, %v1204_v59  }
 0x26b   :  { %v924_v60 = vadd.f32 1e-05, %v872_v22 }
 0x26c   :  { %1335 = vperm.xlu2 %1795, %v1203_v11   ;;  %v1225_v11 = vld [vmem:[%s3517_s4 + $0x48] sm:$0xff] }
 0x26d   :  { %1836 = vrsqrt.f32 %v924_v60  ;;  %vm1136_vm3 = vweird.f32 %v924_v60 }
 0x271   :  { %1355 = vperm.xlu1 %1793, %v1207_v34  }
 0x273   :  { %v1837_v14 = vpop.eup %1836  ;;  %v839_v55 = vpop.xlane.xlu0 %838 }
 0x274   :  { %v1131_v6 = vmul.f32 %v1837_v14, %v924_v60  ;;  %v874_v51 = vmul.f32 0.0051020407, %v839_v55  ;;  %1350 = vperm.xlu2 %1795, %v1206_v5   ;;  %vm1137_vm2 = vweird.f32 %v1837_v14 }
 0x275   :  { %vm1138_vm4 = vmor %vm1136_vm3, %vm1137_vm2 }
 0x276   :  { %v1132_v61 = vmul.f32 %v1837_v14, %v1131_v6  ;;  %v926_v15 = vadd.f32 1e-05, %v874_v51  ;;  %v835_v53 = vpop.xlane.xlu2 %834  ;;  %v900_v6 = vld [vmem:[%s3516_s2 + $0xb0] sm:$0xff] }
 0x277   :  { %v873_v20 = vmul.f32 0.0051020407, %v835_v53 }
 0x278   :  { %v1133_v41 = vmul.f32 0.5, %v1132_v61  ;;  %1838 = vrsqrt.f32 %v926_v15  ;;  %vm1156_vm6 = vweird.f32 %v926_v15 }
 0x279   :  { %v3108_v43 = vadd.f32 1e-05, %v873_v20 }
 0x27a   :  { %v1134_v57 = vsub.f32 1.5, %v1133_v41 }
 0x27b   :  { %1840 = vrsqrt.f32 %v3108_v43  ;;  %v851_v46 = vpop.xlane.xlu0 %850  ;;  %vm1146_vm9 = vweird.f32 %v3108_v43 }
 0x27c   :  { %v877_v38 = vmul.f32 0.0051020407, %v851_v46  ;;  %1365 = vperm.xlu2 %1795, %v1209_v63   ;;  %v1135_v19 = vmul.f32 %v1837_v14, %v1134_v57 }
 0x27e   :  { %v1839_v30 = vpop.eup %1838  ;;  %v3114_v21 = vadd.f32 1e-05, %v877_v38  ;;  %v1296_v44 = vpop.permute.xlu2 %1295  ;;  %v1139_v28 = vsel %vm1138_vm4, %v1837_v14, %v1135_v19  ;;  %v1234_v38 = vld [vmem:[%s3517_s4 + $0x90] sm:$0xff] }
 0x27f   :  { %v1151_v8 = vmul.f32 %v1839_v30, %v926_v15  ;;  %v1408_v40 = vmul.f32 %v1296_v44, %v2534_v4  ;;  %v1409_v52 = vmul.f32 %v1296_v44, %v2537_v42  ;;  %v1210_v35 = vmul.f32 %v1139_v28, %v898_v27 }
 0x280   :  { %1842 = vrsqrt.f32 %v3114_v21  ;;  %v1291_v59 = vpop.permute.xlu1 %1290  ;;  %vm1157_vm5 = vweird.f32 %v1839_v30  ;;  %vm1186_vm12 = vweird.f32 %v3114_v21 }
 0x281   :  { %v1841_v36 = vpop.eup %1840  ;;  %v1152_v23 = vmul.f32 %v1839_v30, %v1151_v8  ;;  %v1460_v18 = vadd.f32 %v1408_v40, %v1226_v50  ;;  %v1461_v22 = vadd.f32 %v1409_v52, %v1227_v37  ;;  %v1406_v4 = vmul.f32 %v1291_v59, %v2516_v48  ;;  %1370 = vperm.xlu1 %1793, %v1210_v35   ;;  %v3612_v48 = vld [vmem:[#allocation2_spill] sm:$0xff]  ;;  %vm1158_vm7 = vmor %vm1156_vm6, %vm1157_vm5  ;;  %v903_v50 = vld [vmem:[%s3516_s2 + $0xc8] sm:$0xff] }
 0x282   :  { %v1141_v42 = vmul.f32 %v1841_v36, %v3108_v43  ;;  %v1407_v1 = vmul.f32 %v1291_v59, %v2519_v31  ;;  %vm1147_vm8 = vweird.f32 %v1841_v36  ;;  %v1235_v43 = vld [vmem:[%s3517_s4 + $0x98] sm:$0xff]  ;;  %v3613_v52 = vld [vmem:[#allocation7_spill] sm:$0xff] }
 0x283   :  { %v1153_v60 = vmul.f32 0.5, %v1152_v23  ;;  %v1668_v29 = vadd.f32 %v3611_v32, %v1460_v18  ;;  %v1669_v3 = vadd.f32 %v3611_v32, %v1461_v22  ;;  %v1458_v7 = vadd.f32 %v1406_v4, %v1224_v62  ;;  %vm1148_vm10 = vmor %vm1146_vm9, %vm1147_vm8  ;;  %v1525_v22 = vld [vmem:[%s3514_s3 + $0xb8] sm:$0xff] }
 0x284   :  { %v1142_v34 = vmul.f32 %v1841_v36, %v1141_v42  ;;  %v1459_v9 = vadd.f32 %v1407_v1, %v1225_v11  ;;  %v3614_v11 = vld [vmem:[#allocation10_spill] sm:$0xff] }
 0x285   :  { %v1154_v10 = vsub.f32 1.5, %v1153_v60  ;;  %1720 = vst [vmem:[%s3518_s5 + $0x50] sm:$0xff] %v1668_v29  ;;  %v1666_v5 = vadd.f32 %v3612_v48, %v1458_v7  ;;  %v3615_v7 = vld [vmem:[#allocation13_spill] sm:$0xff] }
 0x286   :  { %v1843_v14 = vpop.eup %1842  ;;  %v1143_v55 = vmul.f32 0.5, %v1142_v34  ;;  %1721 = vst.msk [vmem:[%s3518_s5 + $0x58] sm:$0xff] %vm513_vm1, %v1669_v3  ;;  %v1667_v31 = vadd.f32 %v3612_v48, %v1459_v9 }
 0x287   :  { %v1181_v45 = vmul.f32 %v1843_v14, %v3114_v21  ;;  %1718 = vst [vmem:[%s3518_s5 + $0x40] sm:$0xff] %v1666_v5  ;;  %v1155_v51 = vmul.f32 %v1839_v30, %v1154_v10  ;;  %vm1187_vm11 = vweird.f32 %v1843_v14 }
 0x288   :  { %v1144_v61 = vsub.f32 1.5, %v1143_v55  ;;  %1719 = vst.msk [vmem:[%s3518_s5 + $0x48] sm:$0xff] %vm513_vm1, %v1667_v31  ;;  %vm1188_vm13 = vmor %vm1186_vm12, %vm1187_vm11  ;;  %v1252_v31 = vld [vmem:[%s3517_s4 + $0x120] sm:$0xff] }
 0x289   :  { %v1182_v15 = vmul.f32 %v1843_v14, %v1181_v45  ;;  %v1159_v53 = vsel %vm1158_vm7, %v1839_v30, %v1155_v51  ;;  %v1253_v45 = vld [vmem:[%s3517_s4 + $0x128] sm:$0xff] }
 0x28a   :  { %v1212_v20 = vmul.f32 %v1159_v53, %v900_v6  ;;  %v1145_v24 = vmul.f32 %v1841_v36, %v1144_v61 }
 0x28b   :  { %v1183_v41 = vmul.f32 0.5, %v1182_v15 }
 0x28c   :  { %1380 = vperm.xlu2 %1795, %v1212_v20   ;;  %v1149_v57 = vsel %vm1148_vm10, %v1841_v36, %v1145_v24 }
 0x28d   :  { %v1184_v63 = vsub.f32 1.5, %v1183_v41  ;;  %v1211_v46 = vmul.f32 %v1149_v57, %v899_v26  ;;  %v3616_v57 = vld [vmem:[#allocation16_spill] sm:$0xff] }
 0x28e   :  { %v1316_v19 = vpop.permute.xlu0 %1315 }
 0x28f   :  { %v1416_v27 = vmul.f32 %v1316_v19, %v2606_v33  ;;  %v1417_v30 = vmul.f32 %v1316_v19, %v2609_v16  ;;  %1375 = vperm.xlu0 %1794, %v1211_v46   ;;  %v1185_v37 = vmul.f32 %v1843_v14, %v1184_v63  ;;  %v1240_v33 = vld [vmem:[%s3517_s4 + $0xc0] sm:$0xff]  ;;  %v1241_v16 = vld [vmem:[%s3517_s4 + $0xc8] sm:$0xff] }
 0x291   :  { %v1468_v44 = vadd.f32 %v1416_v27, %v1234_v38  ;;  %v1469_v28 = vadd.f32 %v1417_v30, %v1235_v43  ;;  %v1189_v8 = vsel %vm1188_vm13, %v1843_v14, %v1185_v37  ;;  %v901_v43 = vld [vmem:[%s3516_s2 + $0xb8] sm:$0xff]  ;;  %v3617_v30 = vld [vmem:[#allocation23_spill] sm:$0xff] }
 0x292   :  { %v1215_v40 = vmul.f32 %v1189_v8, %v903_v50 }
 0x293   :  { %v1676_v62 = vadd.f32 %v3613_v52, %v1468_v44  ;;  %v1677_v59 = vadd.f32 %v3613_v52, %v1469_v28 }
 0x294   :  { %1395 = vperm.xlu2 %1795, %v1215_v40  }
 0x295   :  { %1728 = vst [vmem:[%s3518_s5 + $0x90] sm:$0xff] %v1676_v62  ;;  %v1228_v62 = vld [vmem:[%s3517_s4 + $0x60] sm:$0xff] }
 0x296   :  { %1729 = vst.msk [vmem:[%s3518_s5 + $0x98] sm:$0xff] %vm513_vm1, %v1677_v59  ;;  %v1331_v21 = vpop.permute.xlu0 %1330  ;;  %v1229_v59 = vld [vmem:[%s3517_s4 + $0x68] sm:$0xff] }
 0x297   :  { %v1422_v35 = vmul.f32 %v1331_v21, %v2647_v2  ;;  %v1423_v36 = vmul.f32 %v1331_v21, %v2650_v47  ;;  %v1246_v2 = vld [vmem:[%s3517_s4 + $0xf0] sm:$0xff]  ;;  %v1247_v47 = vld [vmem:[%s3517_s4 + $0xf8] sm:$0xff] }
 0x299   :  { %v1474_v23 = vadd.f32 %v1422_v35, %v1240_v33  ;;  %v1475_v18 = vadd.f32 %v1423_v36, %v1241_v16  ;;  %v3618_v16 = vld [vmem:[#allocation3_spill] sm:$0xff]  ;;  %v3619_v35 = vld [vmem:[#allocation21_spill] sm:$0xff] }
 0x29b   :  { %v1682_v4 = vadd.f32 %v3614_v11, %v1474_v23  ;;  %v1683_v42 = vadd.f32 %v3614_v11, %v1475_v18  ;;  %v3620_v23 = vld [vmem:[#allocation22_spill] sm:$0xff] }
 0x29c   :  { %1645 = vperm.xlu2 %1795, %v1525_v22  }
 0x29d   :  { %1734 = vst [vmem:[%s3518_s5 + $0xc0] sm:$0xff] %v1682_v4 }
 0x29e   :  { %1735 = vst.msk [vmem:[%s3518_s5 + $0xc8] sm:$0xff] %vm513_vm1, %v1683_v42 }
 0x2a0   :  { %v1346_v1 = vpop.permute.xlu0 %1345 }
 0x2a1   :  { %v1428_v60 = vmul.f32 %v1346_v1, %v2680_v0  ;;  %v1429_v32 = vmul.f32 %v1346_v1, %v2683_v39 }
 0x2a3   :  { %v1480_v29 = vadd.f32 %v1428_v60, %v1246_v2  ;;  %v1481_v3 = vadd.f32 %v1429_v32, %v1247_v47  ;;  %v1236_v2 = vld [vmem:[%s3517_s4 + $0xa0] sm:$0xff]  ;;  %v1237_v47 = vld [vmem:[%s3517_s4 + $0xa8] sm:$0xff]  ;;  %v3621_v60 = vld [vmem:[#allocation5_spill] sm:$0xff] }
 0x2a5   :  { %v1688_v34 = vadd.f32 %v3615_v7, %v1480_v29  ;;  %v1689_v9 = vadd.f32 %v3615_v7, %v1481_v3 }
 0x2a7   :  { %1740 = vst [vmem:[%s3518_s5 + $0xf0] sm:$0xff] %v1688_v34 }
 0x2a8   :  { %1741 = vst.msk [vmem:[%s3518_s5 + $0xf8] sm:$0xff] %vm513_vm1, %v1689_v9  ;;  %v1526_v9 = vld [vmem:[%s3514_s3 + $0xc0] sm:$0xff] }
 0x2ab   :  { %v843_v10 = vpop.xlane.xlu1 %842 }
 0x2ac   :  { %v875_v48 = vmul.f32 0.0051020407, %v843_v10 }
 0x2ae   :  { %v927_v0 = vadd.f32 1e-05, %v875_v48 }
 0x2b0   :  { %1844 = vrsqrt.f32 %v927_v0  ;;  %vm1166_vm15 = vweird.f32 %v927_v0 }
 0x2b6   :  { %v1845_v39 = vpop.eup %1844 }
 0x2b7   :  { %v1161_v5 = vmul.f32 %v1845_v39, %v927_v0  ;;  %v847_v14 = vpop.xlane.xlu2 %846  ;;  %vm1167_vm14 = vweird.f32 %v1845_v39 }
 0x2b8   :  { %v876_v55 = vmul.f32 0.0051020407, %v847_v14  ;;  %v1361_v6 = vpop.permute.xlu0 %1360  ;;  %vm1168_vm0 = vmor %vm1166_vm15, %vm1167_vm14  ;;  %v3622_v14 = vld [vmem:[#allocation4_spill] sm:$0xff] }
 0x2b9   :  { %v1162_v51 = vmul.f32 %v1845_v39, %v1161_v5  ;;  %v1434_v61 = vmul.f32 %v1361_v6, %v2722_v13  ;;  %v1435_v15 = vmul.f32 %v1361_v6, %v2725_v54  ;;  %v1230_v54 = vld [vmem:[%s3517_s4 + $0x70] sm:$0xff]  ;;  %v1231_v13 = vld [vmem:[%s3517_s4 + $0x78] sm:$0xff] }
 0x2ba   :  { %v928_v53 = vadd.f32 1e-05, %v876_v55 }
 0x2bb   :  { %v1163_v20 = vmul.f32 0.5, %v1162_v51  ;;  %v1486_v26 = vadd.f32 %v1434_v61, %v1252_v31  ;;  %v1487_v24 = vadd.f32 %v1435_v15, %v1253_v45  ;;  %v3623_v45 = vld [vmem:[#allocation24_spill] sm:$0xff]  ;;  %v3624_v51 = vld [vmem:[#allocation25_spill] sm:$0xff] }
 0x2bc   :  { %1846 = vrsqrt.f32 %v928_v53  ;;  %vm1176_vm3 = vweird.f32 %v928_v53 }
 0x2bd   :  { %v1164_v41 = vsub.f32 1.5, %v1163_v20  ;;  %v1694_v63 = vadd.f32 %v3616_v57, %v1486_v26  ;;  %v1695_v46 = vadd.f32 %v3616_v57, %v1487_v24  ;;  %v1242_v24 = vld [vmem:[%s3517_s4 + $0xd0] sm:$0xff] }
 0x2bf   :  { %1746 = vst [vmem:[%s3518_s5 + $0x120] sm:$0xff] %v1694_v63  ;;  %v1306_v38 = vpop.permute.xlu2 %1305  ;;  %v1165_v19 = vmul.f32 %v1845_v39, %v1164_v41  ;;  %v1243_v41 = vld [vmem:[%s3517_s4 + $0xd8] sm:$0xff]  ;;  %v3625_v63 = vld [vmem:[#allocation12_spill] sm:$0xff] }
 0x2c0   :  { %1747 = vst.msk [vmem:[%s3518_s5 + $0x128] sm:$0xff] %vm513_vm1, %v1695_v46  ;;  %v1412_v27 = vmul.f32 %v1306_v38, %v2570_v49  ;;  %v1413_v50 = vmul.f32 %v1306_v38, %v3617_v30  ;;  %v3626_v38 = vld [vmem:[#allocation28_spill] sm:$0xff] }
 0x2c1   :  { %v1169_v37 = vsel %vm1168_vm0, %v1845_v39, %v1165_v19  ;;  %v902_v39 = vld [vmem:[%s3516_s2 + $0xc0] sm:$0xff]  ;;  %v1238_v30 = vld [vmem:[%s3517_s4 + $0xb0] sm:$0xff] }
 0x2c2   :  { %v1847_v44 = vpop.eup %1846  ;;  %v1464_v28 = vadd.f32 %v1412_v27, %v1230_v54  ;;  %v1465_v8 = vadd.f32 %v1413_v50, %v1231_v13  ;;  %v1213_v40 = vmul.f32 %v1169_v37, %v901_v43  ;;  %v3627_v37 = vld [vmem:[#allocation6_spill] sm:$0xff] }
 0x2c3   :  { %v1171_v52 = vmul.f32 %v1847_v44, %v928_v53  ;;  %v1301_v33 = vpop.permute.xlu1 %1300  ;;  %vm1177_vm2 = vweird.f32 %v1847_v44 }
 0x2c4   :  { %v1672_v21 = vadd.f32 %v3618_v16, %v1464_v28  ;;  %v1673_v49 = vadd.f32 %v3618_v16, %v1465_v8  ;;  %v1410_v36 = vmul.f32 %v1301_v33, %v3619_v35  ;;  %v1411_v18 = vmul.f32 %v1301_v33, %v3620_v23  ;;  %1385 = vperm.xlu1 %1793, %v1213_v40   ;;  %vm1178_vm4 = vmor %vm1176_vm3, %vm1177_vm2  ;;  %v3628_v8 = vld [vmem:[#allocation26_spill] sm:$0xff] }
 0x2c5   :  { %v1172_v22 = vmul.f32 %v1847_v44, %v1171_v52  ;;  %v3629_v52 = vld [vmem:[#allocation27_spill] sm:$0xff] }
 0x2c6   :  { %1724 = vst [vmem:[%s3518_s5 + $0x70] sm:$0xff] %v1672_v21  ;;  %v1462_v11 = vadd.f32 %v1410_v36, %v1228_v62  ;;  %v1463_v4 = vadd.f32 %v1411_v18, %v1229_v59  ;;  %v1527_v59 = vld [vmem:[%s3514_s3 + $0xc8] sm:$0xff]  ;;  %v1248_v21 = vld [vmem:[%s3517_s4 + $0x100] sm:$0xff] }
 0x2c7   :  { %v1173_v42 = vmul.f32 0.5, %v1172_v22  ;;  %1725 = vst.msk [vmem:[%s3518_s5 + $0x78] sm:$0xff] %vm513_vm1, %v1673_v49  ;;  %v1321_v1 = vpop.permute.xlu2 %1320  ;;  %v1249_v49 = vld [vmem:[%s3517_s4 + $0x108] sm:$0xff] }
 0x2c8   :  { %v1670_v32 = vadd.f32 %v3621_v60, %v1462_v11  ;;  %v1671_v29 = vadd.f32 %v3621_v60, %v1463_v4  ;;  %v1418_v3 = vmul.f32 %v1321_v1, %v2624_v25  ;;  %v1419_v7 = vmul.f32 %v1321_v1, %v2627_v56  ;;  %v1232_v56 = vld [vmem:[%s3517_s4 + $0x80] sm:$0xff]  ;;  %v1233_v25 = vld [vmem:[%s3517_s4 + $0x88] sm:$0xff]  ;;  %v3632_v4 = vld [vmem:[#allocation32_spill] sm:$0xff] }
 0x2c9   :  { %v1174_v34 = vsub.f32 1.5, %v1173_v42  ;;  %v3630_v36 = vld [vmem:[#allocation15_spill] sm:$0xff]  ;;  %v1244_v1 = vld [vmem:[%s3517_s4 + $0xe0] sm:$0xff] }
 0x2ca   :  { %1722 = vst [vmem:[%s3518_s5 + $0x60] sm:$0xff] %v1670_v32  ;;  %v1470_v10 = vadd.f32 %v1418_v3, %v1236_v2  ;;  %v1471_v48 = vadd.f32 %v1419_v7, %v1237_v47  ;;  %v3631_v22 = vld [vmem:[#allocation31_spill] sm:$0xff] }
 0x2cb   :  { %1723 = vst.msk [vmem:[%s3518_s5 + $0x68] sm:$0xff] %vm513_vm1, %v1671_v29  ;;  %v1311_v0 = vpop.permute.xlu1 %1310  ;;  %v1175_v5 = vmul.f32 %v1847_v44, %v1174_v34  ;;  %v1245_v60 = vld [vmem:[%s3517_s4 + $0xe8] sm:$0xff]  ;;  %v3633_v29 = vld [vmem:[#allocation8_spill] sm:$0xff]  ;;  %v3634_v34 = vld [vmem:[#allocation29_spill] sm:$0xff] }
 0x2cc   :  { %v1678_v55 = vadd.f32 %v3622_v14, %v1470_v10  ;;  %v1679_v31 = vadd.f32 %v3622_v14, %v1471_v48  ;;  %v1414_v6 = vmul.f32 %v1311_v0, %v3623_v45  ;;  %v1415_v61 = vmul.f32 %v1311_v0, %v3624_v51  ;;  %1650 = vperm.xlu1 %1793, %v1526_v9   ;;  %v3635_v10 = vld [vmem:[#allocation30_spill] sm:$0xff]  ;;  %v1254_v0 = vld [vmem:[%s3517_s4 + $0x130] sm:$0xff]  ;;  %v3636_v14 = vld [vmem:[#allocation17_spill] sm:$0xff] }
 0x2cd   :  { %v1179_v15 = vsel %vm1178_vm4, %v1847_v44, %v1175_v5  ;;  %v3637_v45 = vld [vmem:[#allocation35_spill] sm:$0xff]  ;;  %v3638_v51 = vld [vmem:[#allocation36_spill] sm:$0xff] }
 0x2ce   :  { %1730 = vst [vmem:[%s3518_s5 + $0xa0] sm:$0xff] %v1678_v55  ;;  %v1466_v53 = vadd.f32 %v1414_v6, %v1232_v56  ;;  %v1467_v20 = vadd.f32 %v1415_v61, %v1233_v25  ;;  %v1214_v26 = vmul.f32 %v1179_v15, %v902_v39  ;;  %v1255_v39 = vld [vmem:[%s3517_s4 + $0x138] sm:$0xff] }
 0x2cf   :  { %1731 = vst.msk [vmem:[%s3518_s5 + $0xa8] sm:$0xff] %vm513_vm1, %v1679_v31  ;;  %v1336_v57 = vpop.permute.xlu2 %1335 }
 0x2d0   :  { %v1674_v46 = vadd.f32 %v3625_v63, %v1466_v53  ;;  %v1675_v54 = vadd.f32 %v3625_v63, %v1467_v20  ;;  %v1424_v13 = vmul.f32 %v1336_v57, %v2658_v17  ;;  %v1425_v43 = vmul.f32 %v1336_v57, %v3626_v38  ;;  %1390 = vperm.xlu0 %1794, %v1214_v26   ;;  %v1239_v17 = vld [vmem:[%s3517_s4 + $0xb8] sm:$0xff]  ;;  %v1250_v20 = vld [vmem:[%s3517_s4 + $0x110] sm:$0xff] }
 0x2d1   :  { %v1251_v26 = vld [vmem:[%s3517_s4 + $0x118] sm:$0xff] }
 0x2d2   :  { %1726 = vst [vmem:[%s3518_s5 + $0x80] sm:$0xff] %v1674_v46  ;;  %v1476_v19 = vadd.f32 %v1424_v13, %v1242_v24  ;;  %v1477_v27 = vadd.f32 %v1425_v43, %v1243_v41  ;;  %v3639_v41 = vld [vmem:[#allocation11_spill] sm:$0xff]  ;;  %v3640_v46 = vld [vmem:[#allocation33_spill] sm:$0xff]  ;;  %v3641_v13 = vld [vmem:[#allocation34_spill] sm:$0xff] }
 0x2d3   :  { %1727 = vst.msk [vmem:[%s3518_s5 + $0x88] sm:$0xff] %vm513_vm1, %v1675_v54  ;;  %v1326_v50 = vpop.permute.xlu1 %1325 }
 0x2d4   :  { %v1684_v44 = vadd.f32 %v3627_v37, %v1476_v19  ;;  %v1685_v28 = vadd.f32 %v3627_v37, %v1477_v27  ;;  %v1420_v40 = vmul.f32 %v1326_v50, %v3628_v8  ;;  %v1421_v62 = vmul.f32 %v1326_v50, %v3629_v52  ;;  %v1260_v27 = vld [vmem:[%s3517_s4 + $0x160] sm:$0xff]  ;;  %v3642_v50 = vld [vmem:[#allocation19_spill] sm:$0xff] }
 0x2d6   :  { %1736 = vst [vmem:[%s3518_s5 + $0xd0] sm:$0xff] %v1684_v44  ;;  %v1472_v33 = vadd.f32 %v1420_v40, %v1238_v30  ;;  %v1473_v16 = vadd.f32 %v1421_v62, %v1239_v17  ;;  %v1261_v30 = vld [vmem:[%s3517_s4 + $0x168] sm:$0xff]  ;;  %v3643_v62 = vld [vmem:[#allocation14_spill] sm:$0xff] }
 0x2d7   :  { %1737 = vst.msk [vmem:[%s3518_s5 + $0xd8] sm:$0xff] %vm513_vm1, %v1685_v28  ;;  %v1351_v35 = vpop.permute.xlu2 %1350 }
 0x2d8   :  { %v1680_v23 = vadd.f32 %v3630_v36, %v1472_v33  ;;  %v1681_v18 = vadd.f32 %v3630_v36, %v1473_v16  ;;  %v1430_v11 = vmul.f32 %v1351_v35, %v3631_v22  ;;  %v1431_v42 = vmul.f32 %v1351_v35, %v3632_v4  ;;  %1655 = vperm.xlu0 %1794, %v1527_v59   ;;  %v3645_v35 = vld [vmem:[#allocation37_spill] sm:$0xff]  ;;  %v3646_v22 = vld [vmem:[#allocation20_spill] sm:$0xff] }
 0x2da   :  { %1732 = vst [vmem:[%s3518_s5 + $0xb0] sm:$0xff] %v1680_v23  ;;  %v1482_v2 = vadd.f32 %v1430_v11, %v1248_v21  ;;  %v1483_v47 = vadd.f32 %v1431_v42, %v1249_v49  ;;  %v3644_v21 = vld [vmem:[#allocation38_spill] sm:$0xff]  ;;  %v1258_v42 = vld [vmem:[%s3517_s4 + $0x150] sm:$0xff] }
 0x2db   :  { %1733 = vst.msk [vmem:[%s3518_s5 + $0xb8] sm:$0xff] %vm513_vm1, %v1681_v18  ;;  %v1341_v32 = vpop.permute.xlu1 %1340 }
 0x2dc   :  { %v1690_v3 = vadd.f32 %v3633_v29, %v1482_v2  ;;  %v1691_v7 = vadd.f32 %v3633_v29, %v1483_v47  ;;  %v1426_v9 = vmul.f32 %v1341_v32, %v3634_v34  ;;  %v1427_v48 = vmul.f32 %v1341_v32, %v3635_v10  ;;  %v1259_v2 = vld [vmem:[%s3517_s4 + $0x158] sm:$0xff]  ;;  %v3648_v32 = vld [vmem:[#allocation39_spill] sm:$0xff]  ;;  %v3649_v34 = vld [vmem:[#allocation18_spill] sm:$0xff] }
 0x2de   :  { %1742 = vst [vmem:[%s3518_s5 + $0x100] sm:$0xff] %v1690_v3  ;;  %v1478_v56 = vadd.f32 %v1426_v9, %v1244_v1  ;;  %v1479_v25 = vadd.f32 %v1427_v48, %v1245_v60  ;;  %v3647_v1 = vld [vmem:[#allocation40_spill] sm:$0xff] }
 0x2df   :  { %1743 = vst.msk [vmem:[%s3518_s5 + $0x108] sm:$0xff] %vm513_vm1, %v1691_v7  ;;  %v1366_v5 = vpop.permute.xlu2 %1365 }
 0x2e0   :  { %v1686_v55 = vadd.f32 %v3636_v14, %v1478_v56  ;;  %v1687_v31 = vadd.f32 %v3636_v14, %v1479_v25  ;;  %v1436_v6 = vmul.f32 %v1366_v5, %v3637_v45  ;;  %v1437_v61 = vmul.f32 %v1366_v5, %v3638_v51  ;;  %v1262_v56 = vld [vmem:[%s3517_s4 + $0x170] sm:$0xff]  ;;  %v1263_v25 = vld [vmem:[%s3517_s4 + $0x178] sm:$0xff]  ;;  %v3651_v14 = vld [vmem:[#allocation43_spill] sm:$0xff] }
 0x2e2   :  { %1738 = vst [vmem:[%s3518_s5 + $0xe0] sm:$0xff] %v1686_v55  ;;  %v1488_v15 = vadd.f32 %v1436_v6, %v1254_v0  ;;  %v1489_v53 = vadd.f32 %v1437_v61, %v1255_v39  ;;  %v3650_v39 = vld [vmem:[#allocation44_spill] sm:$0xff] }
 0x2e3   :  { %1739 = vst.msk [vmem:[%s3518_s5 + $0xe8] sm:$0xff] %vm513_vm1, %v1687_v31  ;;  %v1356_v24 = vpop.permute.xlu1 %1355 }
 0x2e4   :  { %v1696_v57 = vadd.f32 %v3639_v41, %v1488_v15  ;;  %v1697_v63 = vadd.f32 %v3639_v41, %v1489_v53  ;;  %v1432_v54 = vmul.f32 %v1356_v24, %v3640_v46  ;;  %v1433_v38 = vmul.f32 %v1356_v24, %v3641_v13  ;;  %v1264_v15 = vld [vmem:[%s3517_s4 + $0x180] sm:$0xff]  ;;  %v1265_v53 = vld [vmem:[%s3517_s4 + $0x188] sm:$0xff]  ;;  %v3653_v41 = vld [vmem:[#allocation45_spill] sm:$0xff] }
 0x2e6   :  { %1748 = vst [vmem:[%s3518_s5 + $0x130] sm:$0xff] %v1696_v57  ;;  %v1484_v43 = vadd.f32 %v1432_v54, %v1250_v20  ;;  %v1485_v19 = vadd.f32 %v1433_v38, %v1251_v26  ;;  %v3652_v26 = vld [vmem:[#allocation46_spill] sm:$0xff]  ;;  %v3655_v54 = vld [vmem:[#allocation41_spill] sm:$0xff] }
 0x2e7   :  { %1749 = vst.msk [vmem:[%s3518_s5 + $0x138] sm:$0xff] %vm513_vm1, %v1697_v63  ;;  %v1381_v17 = vpop.permute.xlu2 %1380  ;;  %v3654_v63 = vld [vmem:[#allocation42_spill] sm:$0xff] }
 0x2e8   :  { %v1692_v37 = vadd.f32 %v3642_v50, %v1484_v43  ;;  %v1693_v44 = vadd.f32 %v3642_v50, %v1485_v19  ;;  %v1442_v28 = vmul.f32 %v1381_v17, %v2785_v12  ;;  %v1443_v8 = vmul.f32 %v1381_v17, %v2779_v58  ;;  %v1256_v58 = vld [vmem:[%s3517_s4 + $0x140] sm:$0xff]  ;;  %v1257_v12 = vld [vmem:[%s3517_s4 + $0x148] sm:$0xff] }
 0x2ea   :  { %1744 = vst [vmem:[%s3518_s5 + $0x110] sm:$0xff] %v1692_v37  ;;  %v1494_v40 = vadd.f32 %v1442_v28, %v1260_v27  ;;  %v1495_v52 = vadd.f32 %v1443_v8, %v1261_v30  ;;  %v1266_v27 = vld [vmem:[%s3517_s4 + $0x190] sm:$0xff]  ;;  %v1267_v30 = vld [vmem:[%s3517_s4 + $0x198] sm:$0xff] }
 0x2eb   :  { %1745 = vst.msk [vmem:[%s3518_s5 + $0x118] sm:$0xff] %vm513_vm1, %v1693_v44 }
 0x2ec   :  { %v1702_v59 = vadd.f32 %v3643_v62, %v1494_v40  ;;  %v1703_v33 = vadd.f32 %v3643_v62, %v1495_v52 }
 0x2ee   :  { %1754 = vst [vmem:[%s3518_s5 + $0x160] sm:$0xff] %v1702_v59 }
 0x2ef   :  { %1755 = vst.msk [vmem:[%s3518_s5 + $0x168] sm:$0xff] %vm513_vm1, %v1703_v33  ;;  %v1396_v48 = vpop.permute.xlu2 %1395 }
 0x2f0   :  { %v1448_v46 = vmul.f32 %v1396_v48, %v3654_v63  ;;  %v1449_v13 = vmul.f32 %v1396_v48, %v3655_v54 }
 0x2f2   :  { %v1500_v37 = vadd.f32 %v1448_v46, %v1266_v27  ;;  %v1501_v44 = vadd.f32 %v1449_v13, %v1267_v30 }
 0x2f3   :  { %v1371_v16 = vpop.permute.xlu1 %1370 }
 0x2f4   :  { %v1438_v49 = vmul.f32 %v1371_v16, %v3644_v21  ;;  %v1439_v36 = vmul.f32 %v1371_v16, %v3645_v35 }
 0x2f6   :  { %v1490_v23 = vadd.f32 %v1438_v49, %v1256_v58  ;;  %v1491_v18 = vadd.f32 %v1439_v36, %v1257_v12 }
 0x2f7   :  { %v1646_v6 = vpop.permute.xlu2 %1645 }
 0x2f8   :  { %v1698_v11 = vadd.f32 %v3646_v22, %v1490_v23  ;;  %v1699_v4 = vadd.f32 %v3646_v22, %v1491_v18 }
 0x2fa   :  { %1750 = vst [vmem:[%s3518_s5 + $0x140] sm:$0xff] %v1698_v11 }
 0x2fb   :  { %1751 = vst.msk [vmem:[%s3518_s5 + $0x148] sm:$0xff] %vm513_vm1, %v1699_v4 }
 0x301   :  { %v1376_v47 = vpop.permute.xlu0 %1375 }
 0x302   :  { %v1440_v60 = vmul.f32 %v1376_v47, %v3647_v1  ;;  %v1441_v29 = vmul.f32 %v1376_v47, %v3648_v32 }
 0x304   :  { %v1492_v3 = vadd.f32 %v1440_v60, %v1258_v42  ;;  %v1493_v7 = vadd.f32 %v1441_v29, %v1259_v2 }
 0x306   :  { %v1700_v9 = vadd.f32 %v3649_v34, %v1492_v3  ;;  %v1701_v10 = vadd.f32 %v3649_v34, %v1493_v7 }
 0x308   :  { %1752 = vst [vmem:[%s3518_s5 + $0x150] sm:$0xff] %v1700_v9 }
 0x309   :  { %1753 = vst.msk [vmem:[%s3518_s5 + $0x158] sm:$0xff] %vm513_vm1, %v1701_v10 }
 0x336   :  { %v1386_v0 = vpop.permute.xlu1 %1385 }
 0x337   :  { %v1444_v5 = vmul.f32 %v1386_v0, %v3650_v39  ;;  %v1445_v55 = vmul.f32 %v1386_v0, %v3651_v14 }
 0x339   :  { %v1496_v31 = vadd.f32 %v1444_v5, %v1262_v56  ;;  %v1497_v45 = vadd.f32 %v1445_v55, %v1263_v25 }
 0x33b   :  { %v1704_v51 = vadd.f32 %v1646_v6, %v1496_v31  ;;  %v1705_v61 = vadd.f32 %v1646_v6, %v1497_v45 }
 0x33d   :  { %1756 = vst [vmem:[%s3518_s5 + $0x170] sm:$0xff] %v1704_v51 }
 0x33e   :  { %1757 = vst.msk [vmem:[%s3518_s5 + $0x178] sm:$0xff] %vm513_vm1, %v1705_v61  ;;  %v1651_v19 = vpop.permute.xlu1 %1650 }
 0x342   :  { %v1391_v20 = vpop.permute.xlu0 %1390 }
 0x343   :  { %v1446_v24 = vmul.f32 %v1391_v20, %v3652_v26  ;;  %v1447_v57 = vmul.f32 %v1391_v20, %v3653_v41 }
 0x345   :  { %v1498_v38 = vadd.f32 %v1446_v24, %v1264_v15  ;;  %v1499_v43 = vadd.f32 %v1447_v57, %v1265_v53 }
 0x347   :  { %v1706_v17 = vadd.f32 %v1651_v19, %v1498_v38  ;;  %v1707_v50 = vadd.f32 %v1651_v19, %v1499_v43 }
 0x349   :  { %1758 = vst [vmem:[%s3518_s5 + $0x180] sm:$0xff] %v1706_v17 }
 0x34a   :  { %1759 = vst.msk [vmem:[%s3518_s5 + $0x188] sm:$0xff] %vm513_vm1, %v1707_v50  ;;  %v1656_v28 = vpop.permute.xlu0 %1655 }
 0x34b   :  { %v1708_v8 = vadd.f32 %v1656_v28, %v1500_v37  ;;  %v1709_v40 = vadd.f32 %v1656_v28, %v1501_v44 }
 0x34d   :  { %1760 = vst [vmem:[%s3518_s5 + $0x190] sm:$0xff] %v1708_v8 }
 0x34e   :  { %1761 = vst.msk [vmem:[%s3518_s5 + $0x198] sm:$0xff] %vm513_vm1, %v1709_v40 }

</bundles_post_ra>
